<compile_context>
chip_gen: v7x
topology: tpu7x:2x2x1
jax: 0.10.0
libtpu: 0.0.40
codegen_flags: <defaults>
</compile_context>

<pallas_src>
import math
import jax
import jax.numpy as jnp
from jax import lax
from jax.experimental import pallas as pl
from jax.experimental.pallas import tpu as pltpu

# ----------------------------- configuration --------------------------------
N = 8            # batch
C_IN = 4         # image channels
H = W = 8        # image spatial
HW = H * W
C_FEAT = 128     # backbone output channels ("in_features")
FC_DIM = 128     # CFG.fc_dim
N_CLASSES = 128  # CFG.classes
MARGIN = 0.5
SCALE = 30.0
GEM_P_INIT = 3.0
GEM_EPS = 1e-6
DROPOUT_P = 0.1
BN_EPS = 1e-5

COS_M = math.cos(MARGIN)
SIN_M = math.sin(MARGIN)
TH = math.cos(math.pi - MARGIN)
MM = math.sin(math.pi - MARGIN) * MARGIN
# keep an element iff hash_bits >= threshold  (P(drop) = DROPOUT_P)
DROP_THRESH = int(DROPOUT_P * (1 << 32)) & 0xFFFFFFFF


def _vmem():
    return pl.BlockSpec(memory_space=pltpu.MemorySpace.VMEM)


def _smem():
    return pl.BlockSpec(memory_space=pltpu.MemorySpace.SMEM)


def _hash_bits_u32(shape, seed_u32):
    """Counter-based uint32 hash (xmur3-style finalizer). Pure jnp ops, so it
    lowers on real TPU (Mosaic) and in interpret mode, unlike pltpu.prng_*.
    TODO(synk): RNG stream differs from torch's nn.Dropout (only mask statistics match)."""
    rows = lax.broadcasted_iota(jnp.int32, shape, 0).astype(jnp.uint32)
    cols = lax.broadcasted_iota(jnp.int32, shape, 1).astype(jnp.uint32)
    h = rows * jnp.uint32(shape[1]) + cols
    h = (h + seed_u32) * jnp.uint32(2654435761)
    h = h ^ (h >> 16)
    h = h * jnp.uint32(0x7FEB352D)
    h = h ^ (h >> 15)
    h = h * jnp.uint32(0x846CA68B)
    h = h ^ (h >> 16)
    return h


# ------------------------------ fused kernel ---------------------------------
def _dog_fused_kernel(p_ref, seed_ref, x_ref, wbb_ref, wcls_ref, bcls_ref,
                      warc_ref, label_ref, o_ref, gem_sc):
    # ---- backbone stand-in: pointwise conv, bf16 operands, f32 accumulate ----
    # (ReLU removed: the GeM clamp(min=eps>0) below subsumes it.)
    f = jnp.dot(x_ref[...], wbb_ref[...],
                preferred_element_type=jnp.float32)          # [N*HW, C_FEAT] f32

    # ---- GeM: avg_pool(clamp(x, eps)^p over HW)^(1/p) -------------------------
    p = p_ref[0]
    # 512 -> (8, 64) sublane split with 64 % 8 == 0: layout-preserving, no VMEM copy.
    f3 = f.reshape(N, HW, C_FEAT)                            # HW on sublanes, C on lanes
    fc = jnp.maximum(f3, GEM_EPS)                            # clamp(min=eps) -> positive
    use_cube = jnp.abs(p - GEM_P_INIT) < 1e-6                # p is exactly 3 at init

    @pl.when(use_cube)
    def _():                                                 # VPU-only fast path (p == 3)
        gem_sc[...] = jnp.mean(fc * fc * fc, axis=1)

    @pl.when(jnp.logical_not(use_cube))
    def _():                                                 # general learned p (EUP path)
        gem_sc[...] = jnp.mean(jnp.exp(p * jnp.log(fc)), axis=1)

    m = gem_sc[...]                                          # [N, C_FEAT]
    pooled = jnp.exp(jnp.log(m) * (1.0 / p))                 # m ** (1/p), single vreg

    # ---- Dropout(p=0.1): integer-threshold mask from counter hash ------------
    seed = seed_ref[0].astype(jnp.uint32)
    bits = _hash_bits_u32(pooled.shape, seed)
    keep = bits >= jnp.uint32(DROP_THRESH)
    xdrop = jnp.where(keep, pooled * (1.0 / (1.0 - DROPOUT_P)), 0.0)

    # ---- Linear + BatchNorm1d (training batch stats, gamma=1, beta=0) --------
    y = jnp.dot(xdrop.astype(jnp.bfloat16), wcls_ref[...],
                preferred_element_type=jnp.float32) + bcls_ref[...]
    mean = jnp.mean(y, axis=0, keepdims=True)
    var = jnp.maximum(jnp.mean(y * y, axis=0, keepdims=True) - mean * mean, 0.0)
    feat = (y - mean) * lax.rsqrt(var + BN_EPS)

    # ---- ArcMarginProduct ------------------------------------------------------
    xn = feat * lax.rsqrt(jnp.sum(feat * feat, axis=-1, keepdims=True) + 1e-24)
    warc = warc_ref[...]                                     # [FC_DIM, N_CLASSES] f32, pre-transposed
    wn = warc * lax.rsqrt(jnp.sum(warc * warc, axis=0, keepdims=True) + 1e-24)
    cosine = jnp.dot(xn.astype(jnp.bfloat16), wn.astype(jnp.bfloat16),
                     preferred_element_type=jnp.float32)     # [N, N_CLASSES]
    sine = jnp.sqrt(jnp.maximum(1.0 - cosine * cosine, 0.0))
    phi = cosine * COS_M - sine * SIN_M
    phi = jnp.where(cosine > TH, phi, cosine - MM)           # easy_margin=False
    classes = lax.broadcasted_iota(jnp.int32, cosine.shape, 1)
    # one_hot*phi + (1-one_hot)*cosine == where(class == label, phi, cosine)
    o_ref[...] = jnp.where(classes == label_ref[...], phi, cosine) * SCALE


# ------------------------------- wrapper --------------------------------------
_COST = pl.CostEstimate(
    flops=2 * (N * HW * C_IN * C_FEAT + N * C_FEAT * FC_DIM + N * FC_DIM * N_CLASSES),
    transcendentals=2 * N * HW * C_FEAT + 4 * N * FC_DIM,
    bytes_accessed=(N * HW * C_IN * 2 + C_IN * C_FEAT * 2 + C_FEAT * FC_DIM * 2
                    + FC_DIM * 4 + FC_DIM * N_CLASSES * 4 + N * 4 + 8
                    + N * N_CLASSES * 4),
)


@jax.jit
def dog_model_forward(image, label, params):
    """Training-mode forward: returns ArcMargin logits [N, N_CLASSES]."""
    n, c, h, w = image.shape
    # One wrapper-side layout shuffle (NCHW -> [N*HW, C_in], bf16 MXU operand);
    # everything after that stays lane-major inside the single fused kernel.
    x2d = image.transpose(0, 2, 3, 1).reshape(n * h * w, c).astype(jnp.bfloat16)
    label2d = label.reshape(-1, 1).astype(jnp.int32)
    return pl.pallas_call(
        _dog_fused_kernel,
        out_shape=jax.ShapeDtypeStruct((n, N_CLASSES), jnp.float32),
        in_specs=[_smem(), _smem(),            # gem_p, dropout_seed (scalars)
                  _vmem(), _vmem(), _vmem(), _vmem(), _vmem(), _vmem()],
        out_specs=_vmem(),
        scratch_shapes=[pltpu.VMEM((N, C_FEAT), jnp.float32)],   # GeM pooled mean
        cost_estimate=_COST,
    )(params["gem_p"], params["dropout_seed"], x2d, params["w_bb"],
      params["w_cls_t"], params["b_cls"], params["w_arc_t"], label2d)


# ------------------------------ parameters ------------------------------------
def init_params(key):
    k_bb, k_cls, k_arc = jax.random.split(key, 3)
    # backbone stand-in: pointwise conv weight (stored bf16 for the MXU)
    w_bb = (jax.random.normal(k_bb, (C_IN, C_FEAT), jnp.float32)
            * math.sqrt(2.0 / C_IN)).astype(jnp.bfloat16)
    # classifier: xavier_normal_ on torch weight [FC_DIM, C_FEAT], bias = 0
    std_cls = math.sqrt(2.0 / (FC_DIM + C_FEAT))
    w_cls = jax.random.normal(k_cls, (FC_DIM, C_FEAT), jnp.float32) * std_cls
    b_cls = jnp.zeros((1, FC_DIM), jnp.float32)
    # ArcMargin: xavier_uniform_ on [N_CLASSES, FC_DIM]; stored pre-transposed
    # ([FC_DIM, N_CLASSES]) and in f32 (normalization done in f32, operands
    # downcast to bf16 only for the cosine matmul).
    lim = math.sqrt(6.0 / (N_CLASSES + FC_DIM))
    w_arc_t = jax.random.uniform(k_arc, (FC_DIM, N_CLASSES), jnp.float32, -lim, lim)
    return {
        "w_bb": w_bb,
        "w_cls_t": w_cls.T.astype(jnp.bfloat16),  # kernel consumes [C_FEAT, FC_DIM] bf16
        "b_cls": b_cls,
        "w_arc_t": w_arc_t,
        "gem_p": jnp.array([GEM_P_INIT], jnp.float32),
        # NOTE: should be threaded per training step; fixed here for a deterministic demo.
        "dropout_seed": jnp.array([12345], jnp.int32),
    }


# --------------------------------- main ----------------------------------------
if __name__ == "__main__":
    key = jax.random.PRNGKey(0)
    k_img, k_lab, k_par = jax.random.split(key, 3)
    image = jax.random.normal(k_img, (N, C_IN, H, W), jnp.float32)
    label = jax.random.randint(k_lab, (N,), 0, N_CLASSES, jnp.int32)
    params = init_params(k_par)

    logits = dog_model_forward(image, label, params)
    logits = jax.block_until_ready(logits)

    assert logits.shape == (N, N_CLASSES)
    assert logits.dtype == jnp.float32
    assert bool(jnp.all(jnp.isfinite(logits)))
    print("KERNEL_OK")
</pallas_src>

<mosaic_0001>
module attributes {stable_mosaic.version = 11 : i64} {
  func.func @_dog_fused_kernel(%arg0: memref<1xf32, #tpu.memory_space<smem>>, %arg1: memref<1xi32, #tpu.memory_space<smem>>, %arg2: memref<512x4xbf16, #tpu.memory_space<vmem>>, %arg3: memref<4x128xbf16, #tpu.memory_space<vmem>>, %arg4: memref<128x128xbf16, #tpu.memory_space<vmem>>, %arg5: memref<1x128xf32, #tpu.memory_space<vmem>>, %arg6: memref<128x128xf32, #tpu.memory_space<vmem>>, %arg7: memref<8x1xi32, #tpu.memory_space<vmem>>, %arg8: memref<8x128xf32, #tpu.memory_space<vmem>>, %arg9: memref<8x128xf32, #tpu.memory_space<vmem>>) attributes {dimension_semantics = [], scalar_prefetch = 0 : i64, scratch_operands = 1 : i64, tpu.core_type = #tpu.core_type<tc>} {
    %c0 = arith.constant 0 : index
    %c0_0 = arith.constant 0 : index
    %0 = vector.load %arg2[%c0, %c0_0] : memref<512x4xbf16, #tpu.memory_space<vmem>>, vector<512x4xbf16>
    %c0_1 = arith.constant 0 : index
    %c0_2 = arith.constant 0 : index
    %1 = vector.load %arg3[%c0_1, %c0_2] : memref<4x128xbf16, #tpu.memory_space<vmem>>, vector<4x128xbf16>
    %cst = arith.constant dense<0.000000e+00> : vector<512x128xf32>
    %2 = tpu.matmul %0, %1, %cst {dimension_numbers = #tpu.dot_dimension_numbers<[1], [0], [0], [1], [0, 0, 1, 1], [], []>} : vector<512x4xbf16>, vector<4x128xbf16>, vector<512x128xf32> -> vector<512x128xf32>
    %c0_3 = arith.constant 0 : index
    %3 = memref.load %arg0[%c0_3] : memref<1xf32, #tpu.memory_space<smem>>
    %4 = vector.shape_cast %2 : vector<512x128xf32> to vector<8x64x128xf32>
    %cst_4 = arith.constant 9.99999997E-7 : f32
    %5 = vector.broadcast %cst_4 : f32 to vector<8x64x128xf32>
    %6 = arith.maximumf %4, %5 : vector<8x64x128xf32>
    %cst_5 = arith.constant 3.000000e+00 : f32
    %7 = arith.subf %3, %cst_5 : f32
    %8 = math.absf %7 : f32
    %cst_6 = arith.constant 9.99999997E-7 : f32
    %9 = arith.cmpf olt, %8, %cst_6 : f32
    %10 = arith.extui %9 : i1 to i32
    %c0_i32 = arith.constant 0 : i32
    %11 = arith.cmpi ne, %10, %c0_i32 : i32
    scf.if %11 {
      %120 = arith.mulf %6, %6 : vector<8x64x128xf32>
      %121 = arith.mulf %120, %6 : vector<8x64x128xf32>
      %cst_44 = arith.constant dense<0.000000e+00> : vector<8x128xf32>
      %122 = vector.multi_reduction <add>, %121, %cst_44 [1] : vector<8x64x128xf32> to vector<8x128xf32>
      %cst_45 = arith.constant 6.400000e+01 : f32
      %123 = vector.broadcast %cst_45 : f32 to vector<8x128xf32>
      %124 = arith.divf %122, %123 : vector<8x128xf32>
      %c0_46 = arith.constant 0 : index
      %c0_47 = arith.constant 0 : index
      %125 = vector.load %arg9[%c0_46, %c0_47] : memref<8x128xf32, #tpu.memory_space<vmem>>, vector<8x128xf32>
      tpu.vector_store %arg9[%c0_46, %c0_47], %124 {strides = array<i32>} : memref<8x128xf32, #tpu.memory_space<vmem>>, vector<8x128xf32>,
    } else {
    }
    %true = arith.constant true
    %12 = arith.xori %9, %true : i1
    %13 = arith.extui %12 : i1 to i32
    %c0_i32_7 = arith.constant 0 : i32
    %14 = arith.cmpi ne, %13, %c0_i32_7 : i32
    scf.if %14 {
      %120 = math.log %6 : vector<8x64x128xf32>
      %121 = vector.broadcast %3 : f32 to vector<8x64x128xf32>
      %122 = arith.mulf %121, %120 : vector<8x64x128xf32>
      %123 = math.exp %122 : vector<8x64x128xf32>
      %cst_44 = arith.constant dense<0.000000e+00> : vector<8x128xf32>
      %124 = vector.multi_reduction <add>, %123, %cst_44 [1] : vector<8x64x128xf32> to vector<8x128xf32>
      %cst_45 = arith.constant 6.400000e+01 : f32
      %125 = vector.broadcast %cst_45 : f32 to vector<8x128xf32>
      %126 = arith.divf %124, %125 : vector<8x128xf32>
      %c0_46 = arith.constant 0 : index
      %c0_47 = arith.constant 0 : index
      %127 = vector.load %arg9[%c0_46, %c0_47] : memref<8x128xf32, #tpu.memory_space<vmem>>, vector<8x128xf32>
      tpu.vector_store %arg9[%c0_46, %c0_47], %126 {strides = array<i32>} : memref<8x128xf32, #tpu.memory_space<vmem>>, vector<8x128xf32>,
    } else {
    }
    %c0_8 = arith.constant 0 : index
    %c0_9 = arith.constant 0 : index
    %15 = vector.load %arg9[%c0_8, %c0_9] : memref<8x128xf32, #tpu.memory_space<vmem>>, vector<8x128xf32>
    %16 = math.log %15 : vector<8x128xf32>
    %cst_10 = arith.constant 1.000000e+00 : f32
    %17 = arith.divf %cst_10, %3 : f32
    %18 = vector.broadcast %17 : f32 to vector<8x128xf32>
    %19 = arith.mulf %16, %18 : vector<8x128xf32>
    %20 = math.exp %19 : vector<8x128xf32>
    %c0_11 = arith.constant 0 : index
    %21 = memref.load %arg1[%c0_11] : memref<1xi32, #tpu.memory_space<smem>>
    %22 = tpu.iota {dimensions = array<i32: 0>} : vector<8x128xi32>
    %23 = tpu.iota {dimensions = array<i32: 1>} : vector<8x128xi32>
    %c128_i32 = arith.constant 128 : i32
    %24 = vector.broadcast %c128_i32 : i32 to vector<8x128xi32>
    %25 = arith.muli %22, %24 : vector<8x128xi32>
    %26 = arith.addi %25, %23 : vector<8x128xi32>
    %27 = vector.broadcast %21 : i32 to vector<8x128xi32>
    %28 = arith.addi %26, %27 : vector<8x128xi32>
    %c-1640531535_i32 = arith.constant -1640531535 : i32
    %29 = vector.broadcast %c-1640531535_i32 : i32 to vector<8x128xi32>
    %30 = arith.muli %28, %29 : vector<8x128xi32>
    %c16_i32 = arith.constant 16 : i32
    %31 = vector.broadcast %c16_i32 : i32 to vector<8x128xi32>
    %32 = arith.shrui %30, %31 : vector<8x128xi32>
    %33 = arith.xori %30, %32 : vector<8x128xi32>
    %c2146121005_i32 = arith.constant 2146121005 : i32
    %34 = vector.broadcast %c2146121005_i32 : i32 to vector<8x128xi32>
    %35 = arith.muli %33, %34 : vector<8x128xi32>
    %c15_i32 = arith.constant 15 : i32
    %36 = vector.broadcast %c15_i32 : i32 to vector<8x128xi32>
    %37 = arith.shrui %35, %36 : vector<8x128xi32>
    %38 = arith.xori %35, %37 : vector<8x128xi32>
    %c-2073254261_i32 = arith.constant -2073254261 : i32
    %39 = vector.broadcast %c-2073254261_i32 : i32 to vector<8x128xi32>
    %40 = arith.muli %38, %39 : vector<8x128xi32>
    %c16_i32_12 = arith.constant 16 : i32
    %41 = vector.broadcast %c16_i32_12 : i32 to vector<8x128xi32>
    %42 = arith.shrui %40, %41 : vector<8x128xi32>
    %43 = arith.xori %40, %42 : vector<8x128xi32>
    %c429496729_i32 = arith.constant 429496729 : i32
    %44 = vector.broadcast %c429496729_i32 : i32 to vector<8x128xi32>
    %45 = arith.cmpi uge, %43, %44 : vector<8x128xi32>
    %cst_13 = arith.constant 1.11111116 : f32
    %46 = vector.broadcast %cst_13 : f32 to vector<8x128xf32>
    %47 = arith.mulf %20, %46 : vector<8x128xf32>
    %cst_14 = arith.constant 0.000000e+00 : f32
    %48 = vector.broadcast %cst_14 : f32 to vector<8x128xf32>
    %49 = arith.select %45, %47, %48 : vector<8x128xi1>, vector<8x128xf32>
    %50 = arith.truncf %49 : vector<8x128xf32> to vector<8x128xbf16>
    %c0_15 = arith.constant 0 : index
    %c0_16 = arith.constant 0 : index
    %51 = vector.load %arg4[%c0_15, %c0_16] : memref<128x128xbf16, #tpu.memory_space<vmem>>, vector<128x128xbf16>
    %cst_17 = arith.constant dense<0.000000e+00> : vector<8x128xf32>
    %52 = tpu.matmul %50, %51, %cst_17 {dimension_numbers = #tpu.dot_dimension_numbers<[1], [0], [0], [1], [0, 0, 1, 1], [], []>} : vector<8x128xbf16>, vector<128x128xbf16>, vector<8x128xf32> -> vector<8x128xf32>
    %c0_18 = arith.constant 0 : index
    %c0_19 = arith.constant 0 : index
    %53 = vector.load %arg5[%c0_18, %c0_19] : memref<1x128xf32, #tpu.memory_space<vmem>>, vector<1x128xf32>
    %54 = vector.broadcast %53 : vector<1x128xf32> to vector<8x128xf32>
    %55 = arith.addf %52, %54 : vector<8x128xf32>
    %cst_20 = arith.constant dense<0.000000e+00> : vector<128xf32>
    %56 = vector.multi_reduction <add>, %55, %cst_20 [0] : vector<8x128xf32> to vector<128xf32>
    %57 = vector.shape_cast %56 : vector<128xf32> to vector<1x128xf32>
    %cst_21 = arith.constant 8.000000e+00 : f32
    %58 = vector.broadcast %cst_21 : f32 to vector<1x128xf32>
    %59 = arith.divf %57, %58 : vector<1x128xf32>
    %60 = arith.mulf %55, %55 : vector<8x128xf32>
    %cst_22 = arith.constant dense<0.000000e+00> : vector<128xf32>
    %61 = vector.multi_reduction <add>, %60, %cst_22 [0] : vector<8x128xf32> to vector<128xf32>
    %62 = vector.shape_cast %61 : vector<128xf32> to vector<1x128xf32>
    %cst_23 = arith.constant 8.000000e+00 : f32
    %63 = vector.broadcast %cst_23 : f32 to vector<1x128xf32>
    %64 = arith.divf %62, %63 : vector<1x128xf32>
    %65 = arith.mulf %59, %59 : vector<1x128xf32>
    %66 = arith.subf %64, %65 : vector<1x128xf32>
    %cst_24 = arith.constant 0.000000e+00 : f32
    %67 = vector.broadcast %cst_24 : f32 to vector<1x128xf32>
    %68 = arith.maximumf %66, %67 : vector<1x128xf32>
    %69 = vector.broadcast %59 : vector<1x128xf32> to vector<8x128xf32>
    %70 = arith.subf %55, %69 : vector<8x128xf32>
    %cst_25 = arith.constant 9.99999974E-6 : f32
    %71 = vector.broadcast %cst_25 : f32 to vector<1x128xf32>
    %72 = arith.addf %68, %71 : vector<1x128xf32>
    %73 = math.rsqrt %72 : vector<1x128xf32>
    %74 = vector.broadcast %73 : vector<1x128xf32> to vector<8x128xf32>
    %75 = arith.mulf %70, %74 : vector<8x128xf32>
    %76 = arith.mulf %75, %75 : vector<8x128xf32>
    %cst_26 = arith.constant dense<0.000000e+00> : vector<8xf32>
    %77 = vector.multi_reduction <add>, %76, %cst_26 [1] : vector<8x128xf32> to vector<8xf32>
    %78 = vector.shape_cast %77 : vector<8xf32> to vector<8x1xf32>
    %cst_27 = arith.constant 1.000000e-24 : f32
    %79 = vector.broadcast %cst_27 : f32 to vector<8x1xf32>
    %80 = arith.addf %78, %79 : vector<8x1xf32>
    %81 = math.rsqrt %80 : vector<8x1xf32>
    %82 = vector.broadcast %81 : vector<8x1xf32> to vector<8x128xf32>
    %83 = arith.mulf %75, %82 : vector<8x128xf32>
    %c0_28 = arith.constant 0 : index
    %c0_29 = arith.constant 0 : index
    %84 = vector.load %arg6[%c0_28, %c0_29] : memref<128x128xf32, #tpu.memory_space<vmem>>, vector<128x128xf32>
    %85 = arith.mulf %84, %84 : vector<128x128xf32>
    %cst_30 = arith.constant dense<0.000000e+00> : vector<128xf32>
    %86 = vector.multi_reduction <add>, %85, %cst_30 [0] : vector<128x128xf32> to vector<128xf32>
    %87 = vector.shape_cast %86 : vector<128xf32> to vector<1x128xf32>
    %cst_31 = arith.constant 1.000000e-24 : f32
    %88 = vector.broadcast %cst_31 : f32 to vector<1x128xf32>
    %89 = arith.addf %87, %88 : vector<1x128xf32>
    %90 = math.rsqrt %89 : vector<1x128xf32>
    %91 = vector.broadcast %90 : vector<1x128xf32> to vector<128x128xf32>
    %92 = arith.mulf %84, %91 : vector<128x128xf32>
    %93 = arith.truncf %83 : vector<8x128xf32> to vector<8x128xbf16>
    %94 = arith.truncf %92 : vector<128x128xf32> to vector<128x128xbf16>
    %cst_32 = arith.constant dense<0.000000e+00> : vector<8x128xf32>
    %95 = tpu.matmul %93, %94, %cst_32 {dimension_numbers = #tpu.dot_dimension_numbers<[1], [0], [0], [1], [0, 0, 1, 1], [], []>} : vector<8x128xbf16>, vector<128x128xbf16>, vector<8x128xf32> -> vector<8x128xf32>
    %96 = arith.mulf %95, %95 : vector<8x128xf32>
    %cst_33 = arith.constant 1.000000e+00 : f32
    %97 = vector.broadcast %cst_33 : f32 to vector<8x128xf32>
    %98 = arith.subf %97, %96 : vector<8x128xf32>
    %cst_34 = arith.constant 0.000000e+00 : f32
    %99 = vector.broadcast %cst_34 : f32 to vector<8x128xf32>
    %100 = arith.maximumf %98, %99 : vector<8x128xf32>
    %101 = math.sqrt %100 : vector<8x128xf32>
    %cst_35 = arith.constant 0.87758255 : f32
    %102 = vector.broadcast %cst_35 : f32 to vector<8x128xf32>
    %103 = arith.mulf %95, %102 : vector<8x128xf32>
    %cst_36 = arith.constant 0.47942555 : f32
    %104 = vector.broadcast %cst_36 : f32 to vector<8x128xf32>
    %105 = arith.mulf %101, %104 : vector<8x128xf32>
    %106 = arith.subf %103, %105 : vector<8x128xf32>
    %cst_37 = arith.constant -0.87758255 : f32
    %107 = vector.broadcast %cst_37 : f32 to vector<8x128xf32>
    %108 = arith.cmpf ogt, %95, %107 : vector<8x128xf32>
    %cst_38 = arith.constant 0.239712775 : f32
    %109 = vector.broadcast %cst_38 : f32 to vector<8x128xf32>
    %110 = arith.subf %95, %109 : vector<8x128xf32>
    %111 = arith.select %108, %106, %110 : vector<8x128xi1>, vector<8x128xf32>
    %112 = tpu.iota {dimensions = array<i32: 1>} : vector<8x128xi32>
    %c0_39 = arith.constant 0 : index
    %c0_40 = arith.constant 0 : index
    %113 = vector.load %arg7[%c0_39, %c0_40] : memref<8x1xi32, #tpu.memory_space<vmem>>, vector<8x1xi32>
    %114 = vector.broadcast %113 : vector<8x1xi32> to vector<8x128xi32>
    %115 = arith.cmpi eq, %112, %114 : vector<8x128xi32>
    %116 = arith.select %115, %111, %95 : vector<8x128xi1>, vector<8x128xf32>
    %cst_41 = arith.constant 3.000000e+01 : f32
    %117 = vector.broadcast %cst_41 : f32 to vector<8x128xf32>
    %118 = arith.mulf %116, %117 : vector<8x128xf32>
    %c0_42 = arith.constant 0 : index
    %c0_43 = arith.constant 0 : index
    %119 = vector.load %arg8[%c0_42, %c0_43] : memref<8x128xf32, #tpu.memory_space<vmem>>, vector<8x128xf32>
    tpu.vector_store %arg8[%c0_42, %c0_43], %118 {strides = array<i32>} : memref<8x128xf32, #tpu.memory_space<vmem>>, vector<8x128xf32>,
    return
  }
}

</mosaic_0001>

<bundles_post_ra>
// kernel: dog_model_forward.1
= control target key start
LH: loop header
LB: loop body
LE: loop exit
PB: predicated region body
PF: predicated region fallthrough
CT: control target
= control target key end

     0   :  { %s3833_s0 = inlined_call_operand.<no memory space> [shape: f32[1], index: 0, kind: input, shape index: {}]   ;;  %s3834_s1 = inlined_call_operand.<no memory space> [shape: s32[1], index: 1, kind: input, shape index: {}]   ;;  %s3835_s2 = inlined_call_operand.vmem [shape: bf16[512,4], index: 2, kind: input, shape index: {}]   ;;  %s3836_s3 = inlined_call_operand.vmem [shape: bf16[4,128], index: 3, kind: input, shape index: {}]   ;;  %s3837_s4 = inlined_call_operand.vmem [shape: bf16[128,128], index: 4, kind: input, shape index: {}]   ;;  %s3838_s5 = inlined_call_operand.vmem [shape: f32[1,128], index: 5, kind: input, shape index: {}]   ;;  %s3839_s6 = inlined_call_operand.vmem [shape: f32[128,128], index: 6, kind: input, shape index: {}]   ;;  %s3840_s7 = inlined_call_operand.vmem [shape: s32[8,1], index: 7, kind: input, shape index: {}]   ;;  %s3841_s8 = inlined_call_operand.hbm [shape: f32[8,128], index: 8, kind: output, shape index: {}]  }
   0x1   :  { %14 = sst [smem:[#allocation4]] %s3834_s1 }
   0x2   :  { %15 = vsyncpa [#allocation6], 0  ;;  %v97_v0 = vld [vmem:[%s3836_s3] sm:$0x3]  ;;  %vm355_vm0 = vcmask 1041408   ;;  %vm258_vm1 = vcmask 31744  }
   0x3   :  { %v2020_v1 = vld [vmem:[%s3835_s2] sm:$0xff]   ;;  %2012 = vmatprep.subr.msk.bf16.mxu0 %vm355_vm0, %v97_v0  ;;  %v357_v2 = vsel %vm355_vm0, %v97_v0, 0  ;;  %2013 = vmatprep.subr.msk.bf16.mxu1 %vm355_vm0, %v97_v0  ;;  %v2021_v3 = vld [vmem:[%s3835_s2 + $0x8] sm:$0xff]   ;;  %v2022_v4 = vld [vmem:[%s3835_s2 + $0x10] sm:$0xff]   ;;  %s1839_s25 = sadd.f32 -3.0, %s3833_s0 }
   0x4   :  { %1905 = vmatpush3.bf16.msra.mxu0 %v357_v2  ;;  %1906 = vmatprep.mubr.msk.bf16.mxu0 %vm258_vm1, %v2020_v1  ;;  %v2023_v5 = vld [vmem:[%s3835_s2 + $0x18] sm:$0xff]   ;;  %v2024_v6 = vld [vmem:[%s3835_s2 + $0x20] sm:$0xff]   ;;  %v2032_v7 = vld [vmem:[%s3835_s2 + $0xb0] sm:$0xff]  }
   0x5   :  { %2011 = vmatpush3.bf16.msra.mxu1 %v357_v2  ;;  %v2033_v8 = vld [vmem:[%s3835_s2 + $0xb8] sm:$0xff]   ;;  %1950 = vmatprep.mubr.msk.bf16.mxu1 %vm258_vm1, %v2032_v7  ;;  %v2025_v9 = vld [vmem:[%s3835_s2 + $0x28] sm:$0xff]   ;;  %v2036_v10 = vld [vmem:[%s3835_s2 + $0xc0] sm:$0xff]   ;;  %s2541_s26 = sand.u32 2147483647, %s1839_s25 }
   0x6   :  { %v2026_v11 = vld [vmem:[%s3835_s2 + $0x30] sm:$0xff]   ;;  %v2037_v12 = vld [vmem:[%s3835_s2 + $0xc8] sm:$0xff]   ;;  %v2027_v14 = vld [vmem:[%s3835_s2 + $0x38] sm:$0xff]   ;;  %p715_p0 = scmp.lt.f32.partialorder %s2541_s26, 1e-06 }
   0x7   :  { %1907 = vmatmul.mubr.msk.bf16.vlgmr.msra.gmra.mrb[0].mxu0 %vm258_vm1, %v2021_v3  ;;  %v2040_v13 = vld [vmem:[%s3835_s2 + $0xd0] sm:$0xff]   ;;  %v2028_v15 = vld [vmem:[%s3835_s2 + $0x40] sm:$0xff]   ;;  %v2041_v16 = vld [vmem:[%s3835_s2 + $0xd8] sm:$0xff]  }
   0x8   :  { %1910 = vmatprep.mubr.msk.bf16.mxu0 %vm258_vm1, %v2022_v4  ;;  %1951 = vmatmul.mubr.msk.bf16.vlgmr.msra.gmra.mrb[0].mxu1 %vm258_vm1, %v2033_v8  ;;  %v2044_v17 = vld [vmem:[%s3835_s2 + $0xe0] sm:$0xff]   ;;  %v2029_v18 = vld [vmem:[%s3835_s2 + $0x48] sm:$0xff]   ;;  %v2030_v19 = vld [vmem:[%s3835_s2 + $0x50] sm:$0xff]  }
   0x9   :  { %1954 = vmatprep.mubr.msk.bf16.mxu1 %vm258_vm1, %v2036_v10  ;;  %v2045_v20 = vld [vmem:[%s3835_s2 + $0xe8] sm:$0xff]   ;;  %v2048_v21 = vld [vmem:[%s3835_s2 + $0xf0] sm:$0xff]   ;;  %v2031_v22 = vld [vmem:[%s3835_s2 + $0x58] sm:$0xff]  }
   0xa   :  { %v2034_v23 = vld [vmem:[%s3835_s2 + $0x60] sm:$0xff]   ;;  %v2049_v24 = vld [vmem:[%s3835_s2 + $0xf8] sm:$0xff]   ;;  %v2035_v25 = vld [vmem:[%s3835_s2 + $0x68] sm:$0xff]  }
   0xb   :  { %v2038_v26 = vld [vmem:[%s3835_s2 + $0x70] sm:$0xff]   ;;  %v2039_v27 = vld [vmem:[%s3835_s2 + $0x78] sm:$0xff]   ;;  %v2042_v28 = vld [vmem:[%s3835_s2 + $0x80] sm:$0xff]  }
   0xc   :  { %v2043_v29 = vld [vmem:[%s3835_s2 + $0x88] sm:$0xff]   ;;  %v2046_v30 = vld [vmem:[%s3835_s2 + $0x90] sm:$0xff]   ;;  %v2047_v31 = vld [vmem:[%s3835_s2 + $0x98] sm:$0xff]  }
   0xd   :  { %v2050_v32 = vld [vmem:[%s3835_s2 + $0xa0] sm:$0xff]   ;;  %v2051_v33 = vld [vmem:[%s3835_s2 + $0xa8] sm:$0xff]  }
   0xf   :  { %1911 = vmatmul.mubr.msk.bf16.gmra.mrb[4].mxu0 %vm258_vm1, %v2023_v5 }
  0x10   :  { %1914 = vmatprep.mubr.msk.bf16.mxu0 %vm258_vm1, %v2024_v6  ;;  %1955 = vmatmul.mubr.msk.bf16.gmra.mrb[4].mxu1 %vm258_vm1, %v2037_v12 }
  0x11   :  { %1958 = vmatprep.mubr.msk.bf16.mxu1 %vm258_vm1, %v2040_v13 }
  0x17   :  { %1915 = vmatmul.mubr.msk.bf16.gmra.mrb[8].mxu0 %vm258_vm1, %v2025_v9 }
  0x18   :  { %1918 = vmatprep.mubr.msk.bf16.mxu0 %vm258_vm1, %v2026_v11  ;;  %1959 = vmatmul.mubr.msk.bf16.gmra.mrb[8].mxu1 %vm258_vm1, %v2041_v16 }
  0x19   :  { %1962 = vmatprep.mubr.msk.bf16.mxu1 %vm258_vm1, %v2044_v17 }
  0x1f   :  { %1919 = vmatmul.mubr.msk.bf16.gmra.mrb[12].mxu0 %vm258_vm1, %v2027_v14 }
  0x20   :  { %1922 = vmatprep.mubr.msk.bf16.mxu0 %vm258_vm1, %v2028_v15  ;;  %1963 = vmatmul.mubr.msk.bf16.gmra.mrb[12].mxu1 %vm258_vm1, %v2045_v20 }
  0x21   :  { %1966 = vmatprep.mubr.msk.bf16.mxu1 %vm258_vm1, %v2048_v21 }
  0x27   :  { %1923 = vmatmul.mubr.msk.bf16.gmra.mrb[16].mxu0 %vm258_vm1, %v2029_v18 }
  0x28   :  { %1926 = vmatprep.mubr.msk.bf16.mxu0 %vm258_vm1, %v2030_v19  ;;  %1967 = vmatmul.mubr.msk.bf16.gmra.mrb[16].mxu1 %vm258_vm1, %v2049_v24 }
  0x2f   :  { %1927 = vmatmul.mubr.msk.bf16.gmra.mrb[20].mxu0 %vm258_vm1, %v2031_v22 }
  0x30   :  { %1930 = vmatprep.mubr.msk.bf16.mxu0 %vm258_vm1, %v2034_v23 }
  0x37   :  { %1931 = vmatmul.mubr.msk.bf16.gmra.mrb[24].mxu0 %vm258_vm1, %v2035_v25 }
  0x38   :  { %1934 = vmatprep.mubr.msk.bf16.mxu0 %vm258_vm1, %v2038_v26 }
  0x3f   :  { %1935 = vmatmul.mubr.msk.bf16.gmra.mrb[28].mxu0 %vm258_vm1, %v2039_v27 }
  0x40   :  { %1938 = vmatprep.mubr.msk.bf16.mxu0 %vm258_vm1, %v2042_v28 }
  0x47   :  { %1939 = vmatmul.mubr.msk.bf16.gmra.mrb[32].mxu0 %vm258_vm1, %v2043_v29 }
  0x48   :  { %1942 = vmatprep.mubr.msk.bf16.mxu0 %vm258_vm1, %v2046_v30 }
  0x4f   :  { %1943 = vmatmul.mubr.msk.bf16.gmra.mrb[36].mxu0 %vm258_vm1, %v2047_v31 }
  0x50   :  { %1946 = vmatprep.mubr.msk.bf16.mxu0 %vm258_vm1, %v2050_v32 }
  0x57   :  { %1947 = vmatmul.mubr.msk.bf16.gmra.mrb[40].mxu0 %vm258_vm1, %v2051_v33 }
  0xda   :  { %v1908_v34 = vpop.f32.mrb[0].mxu0 }
  0xdb   :  { %v2544_v35 = vmax.f32 %v1908_v34, 1e-06  ;;  %v393_v36 = vpop.f32.mrb[1].mxu0  ;;  %v1952_v49 = vpop.f32.mrb[0].mxu1 }
  0xdc   :  { %v2546_v37 = vmax.f32 %v393_v36, 1e-06  ;;  %v1909_v38 = vpop.f32.mrb[2].mxu0  ;;  %v2560_v51 = vmax.f32 %v1952_v49, 1e-06  ;;  %v569_v52 = vpop.f32.mrb[1].mxu1 }
  0xdd   :  { %3906 = vst [vmem:[#allocation8_spill] sm:$0xff] %v2544_v35  ;;  %v2548_v39 = vmax.f32 %v1909_v38, 1e-06  ;;  %v396_v40 = vpop.f32.mrb[3].mxu0  ;;  %v2562_v53 = vmax.f32 %v569_v52, 1e-06 }
  0xde   :  { %3907 = vst [vmem:[#allocation9_spill] sm:$0xff] %v2546_v37  ;;  %v2550_v41 = vmax.f32 %v396_v40, 1e-06  ;;  %3914 = vst [vmem:[#allocation16_spill] sm:$0xff] %v2560_v51  ;;  %v1953_v54 = vpop.f32.mrb[2].mxu1 }
  0xdf   :  { %3908 = vst [vmem:[#allocation10_spill] sm:$0xff] %v2548_v39  ;;  %3915 = vst [vmem:[#allocation17_spill] sm:$0xff] %v2562_v53  ;;  %v2564_v55 = vmax.f32 %v1953_v54, 1e-06  ;;  %v572_v56 = vpop.f32.mrb[3].mxu1 }
  0xe0   :  { %3909 = vst [vmem:[#allocation11_spill] sm:$0xff] %v2550_v41  ;;  %v2566_v57 = vmax.f32 %v572_v56, 1e-06 }
  0xe1   :  { %3916 = vst [vmem:[#allocation18_spill] sm:$0xff] %v2564_v55 }
  0xe2   :  { %v1912_v42 = vpop.f32.mrb[4].mxu0  ;;  %3917 = vst [vmem:[#allocation19_spill] sm:$0xff] %v2566_v57 }
  0xe3   :  { %v2552_v43 = vmax.f32 %v1912_v42, 1e-06  ;;  %v409_v44 = vpop.f32.mrb[5].mxu0  ;;  %v1956_v1 = vpop.f32.mrb[4].mxu1 }
  0xe4   :  { %v2554_v45 = vmax.f32 %v409_v44, 1e-06  ;;  %v1913_v46 = vpop.f32.mrb[6].mxu0  ;;  %v2576_v3 = vmax.f32 %v1956_v1, 1e-06  ;;  %v585_v4 = vpop.f32.mrb[5].mxu1 }
  0xe5   :  { %3910 = vst [vmem:[#allocation12_spill] sm:$0xff] %v2552_v43  ;;  %v2556_v47 = vmax.f32 %v1913_v46, 1e-06  ;;  %v412_v48 = vpop.f32.mrb[7].mxu0  ;;  %v2578_v5 = vmax.f32 %v585_v4, 1e-06 }
  0xe6   :  { %3911 = vst [vmem:[#allocation13_spill] sm:$0xff] %v2554_v45  ;;  %v2558_v50 = vmax.f32 %v412_v48, 1e-06  ;;  %3922 = vst [vmem:[#allocation24_spill] sm:$0xff] %v2576_v3  ;;  %v1957_v6 = vpop.f32.mrb[6].mxu1 }
  0xe7   :  { %3912 = vst [vmem:[#allocation14_spill] sm:$0xff] %v2556_v47  ;;  %3923 = vst [vmem:[#allocation25_spill] sm:$0xff] %v2578_v5  ;;  %v2580_v7 = vmax.f32 %v1957_v6, 1e-06  ;;  %v588_v8 = vpop.f32.mrb[7].mxu1 }
  0xe8   :  { %3913 = vst [vmem:[#allocation15_spill] sm:$0xff] %v2558_v50  ;;  %v2582_v9 = vmax.f32 %v588_v8, 1e-06 }
  0xe9   :  { %3924 = vst [vmem:[#allocation26_spill] sm:$0xff] %v2580_v7 }
  0xea   :  { %v1916_v58 = vpop.f32.mrb[8].mxu0  ;;  %3925 = vst [vmem:[#allocation27_spill] sm:$0xff] %v2582_v9 }
  0xeb   :  { %v2568_v59 = vmax.f32 %v1916_v58, 1e-06  ;;  %v425_v60 = vpop.f32.mrb[9].mxu0  ;;  %v1960_v17 = vpop.f32.mrb[8].mxu1 }
  0xec   :  { %v2570_v61 = vmax.f32 %v425_v60, 1e-06  ;;  %v1917_v62 = vpop.f32.mrb[10].mxu0  ;;  %v2592_v19 = vmax.f32 %v1960_v17, 1e-06  ;;  %v601_v20 = vpop.f32.mrb[9].mxu1 }
  0xed   :  { %3918 = vst [vmem:[#allocation20_spill] sm:$0xff] %v2568_v59  ;;  %v2572_v63 = vmax.f32 %v1917_v62, 1e-06  ;;  %v428_v0 = vpop.f32.mrb[11].mxu0  ;;  %v2594_v21 = vmax.f32 %v601_v20, 1e-06 }
  0xee   :  { %3919 = vst [vmem:[#allocation21_spill] sm:$0xff] %v2570_v61  ;;  %v2574_v2 = vmax.f32 %v428_v0, 1e-06  ;;  %3930 = vst [vmem:[#allocation32_spill] sm:$0xff] %v2592_v19  ;;  %v1961_v22 = vpop.f32.mrb[10].mxu1 }
  0xef   :  { %3920 = vst [vmem:[#allocation22_spill] sm:$0xff] %v2572_v63  ;;  %3931 = vst [vmem:[#allocation33_spill] sm:$0xff] %v2594_v21  ;;  %v2596_v23 = vmax.f32 %v1961_v22, 1e-06  ;;  %v604_v24 = vpop.f32.mrb[11].mxu1 }
  0xf0   :  { %3921 = vst [vmem:[#allocation23_spill] sm:$0xff] %v2574_v2  ;;  %v2598_v25 = vmax.f32 %v604_v24, 1e-06 }
  0xf1   :  { %3932 = vst [vmem:[#allocation34_spill] sm:$0xff] %v2596_v23 }
  0xf2   :  { %v1920_v10 = vpop.f32.mrb[12].mxu0  ;;  %3933 = vst [vmem:[#allocation35_spill] sm:$0xff] %v2598_v25 }
  0xf3   :  { %v2584_v11 = vmax.f32 %v1920_v10, 1e-06  ;;  %v441_v12 = vpop.f32.mrb[13].mxu0  ;;  %v1964_v33 = vpop.f32.mrb[12].mxu1 }
  0xf4   :  { %v2586_v13 = vmax.f32 %v441_v12, 1e-06  ;;  %v1921_v14 = vpop.f32.mrb[14].mxu0  ;;  %v2608_v36 = vmax.f32 %v1964_v33, 1e-06  ;;  %v617_v38 = vpop.f32.mrb[13].mxu1 }
  0xf5   :  { %3926 = vst [vmem:[#allocation28_spill] sm:$0xff] %v2584_v11  ;;  %v2588_v15 = vmax.f32 %v1921_v14, 1e-06  ;;  %v444_v16 = vpop.f32.mrb[15].mxu0  ;;  %v2610_v40 = vmax.f32 %v617_v38, 1e-06 }
  0xf6   :  { %3927 = vst [vmem:[#allocation29_spill] sm:$0xff] %v2586_v13  ;;  %v2590_v18 = vmax.f32 %v444_v16, 1e-06  ;;  %3938 = vst [vmem:[#allocation40_spill] sm:$0xff] %v2608_v36  ;;  %v1965_v42 = vpop.f32.mrb[14].mxu1 }
  0xf7   :  { %3928 = vst [vmem:[#allocation30_spill] sm:$0xff] %v2588_v15  ;;  %3939 = vst [vmem:[#allocation41_spill] sm:$0xff] %v2610_v40  ;;  %v2612_v44 = vmax.f32 %v1965_v42, 1e-06  ;;  %v620_v46 = vpop.f32.mrb[15].mxu1 }
  0xf8   :  { %3929 = vst [vmem:[#allocation31_spill] sm:$0xff] %v2590_v18  ;;  %v2614_v48 = vmax.f32 %v620_v46, 1e-06 }
  0xf9   :  { %3940 = vst [vmem:[#allocation42_spill] sm:$0xff] %v2612_v44 }
  0xfa   :  { %v1924_v26 = vpop.f32.mrb[16].mxu0  ;;  %3941 = vst [vmem:[#allocation43_spill] sm:$0xff] %v2614_v48 }
  0xfb   :  { %v2600_v27 = vmax.f32 %v1924_v26, 1e-06  ;;  %v457_v28 = vpop.f32.mrb[17].mxu0  ;;  %v1968_v0 = vpop.f32.mrb[16].mxu1 }
  0xfc   :  { %v2602_v29 = vmax.f32 %v457_v28, 1e-06  ;;  %v1925_v30 = vpop.f32.mrb[18].mxu0  ;;  %v2624_v4 = vmax.f32 %v1968_v0, 1e-06  ;;  %v633_v6 = vpop.f32.mrb[17].mxu1 }
  0xfd   :  { %3934 = vst [vmem:[#allocation36_spill] sm:$0xff] %v2600_v27  ;;  %v2604_v31 = vmax.f32 %v1925_v30, 1e-06  ;;  %v460_v32 = vpop.f32.mrb[19].mxu0  ;;  %v2626_v8 = vmax.f32 %v633_v6, 1e-06 }
  0xfe   :  { %3935 = vst [vmem:[#allocation37_spill] sm:$0xff] %v2602_v29  ;;  %v2606_v34 = vmax.f32 %v460_v32, 1e-06  ;;  %3946 = vst [vmem:[#allocation48_spill] sm:$0xff] %v2624_v4  ;;  %v1969_v10 = vpop.f32.mrb[18].mxu1 }
  0xff   :  { %3936 = vst [vmem:[#allocation38_spill] sm:$0xff] %v2604_v31  ;;  %3947 = vst [vmem:[#allocation49_spill] sm:$0xff] %v2626_v8  ;;  %v2628_v12 = vmax.f32 %v1969_v10, 1e-06  ;;  %v636_v14 = vpop.f32.mrb[19].mxu1 }
 0x100   :  { %3937 = vst [vmem:[#allocation39_spill] sm:$0xff] %v2606_v34  ;;  %v2630_v16 = vmax.f32 %v636_v14, 1e-06 }
 0x101   :  { %3948 = vst [vmem:[#allocation50_spill] sm:$0xff] %v2628_v12 }
 0x102   :  { %v1928_v49 = vpop.f32.mrb[20].mxu0  ;;  %3949 = vst [vmem:[#allocation51_spill] sm:$0xff] %v2630_v16 }
 0x103   :  { %v2616_v52 = vmax.f32 %v1928_v49, 1e-06  ;;  %v473_v54 = vpop.f32.mrb[21].mxu0 }
 0x104   :  { %v2618_v56 = vmax.f32 %v473_v54, 1e-06  ;;  %v1929_v58 = vpop.f32.mrb[22].mxu0 }
 0x105   :  { %3942 = vst [vmem:[#allocation44_spill] sm:$0xff] %v2616_v52  ;;  %v2620_v60 = vmax.f32 %v1929_v58, 1e-06  ;;  %v476_v62 = vpop.f32.mrb[23].mxu0 }
 0x106   :  { %3943 = vst [vmem:[#allocation45_spill] sm:$0xff] %v2618_v56  ;;  %v2622_v1 = vmax.f32 %v476_v62, 1e-06 }
 0x107   :  { %3944 = vst [vmem:[#allocation46_spill] sm:$0xff] %v2620_v60 }
 0x108   :  { %3945 = vst [vmem:[#allocation47_spill] sm:$0xff] %v2622_v1 }
 0x10a   :  { %v1932_v17 = vpop.f32.mrb[24].mxu0 }
 0x10b   :  { %v2632_v20 = vmax.f32 %v1932_v17, 1e-06  ;;  %v489_v22 = vpop.f32.mrb[25].mxu0 }
 0x10c   :  { %v2634_v24 = vmax.f32 %v489_v22, 1e-06  ;;  %v1933_v26 = vpop.f32.mrb[26].mxu0 }
 0x10d   :  { %3950 = vst [vmem:[#allocation52_spill] sm:$0xff] %v2632_v20  ;;  %v2636_v28 = vmax.f32 %v1933_v26, 1e-06  ;;  %v492_v30 = vpop.f32.mrb[27].mxu0 }
 0x10e   :  { %3951 = vst [vmem:[#allocation53_spill] sm:$0xff] %v2634_v24  ;;  %v2638_v32 = vmax.f32 %v492_v30, 1e-06 }
 0x10f   :  { %3952 = vst [vmem:[#allocation54_spill] sm:$0xff] %v2636_v28 }
 0x110   :  { %3953 = vst [vmem:[#allocation55_spill] sm:$0xff] %v2638_v32 }
 0x112   :  { %v1936_v33 = vpop.f32.mrb[28].mxu0 }
 0x113   :  { %v2640_v38 = vmax.f32 %v1936_v33, 1e-06  ;;  %v505_v42 = vpop.f32.mrb[29].mxu0 }
 0x114   :  { %v2642_v46 = vmax.f32 %v505_v42, 1e-06  ;;  %v1937_v49 = vpop.f32.mrb[30].mxu0 }
 0x115   :  { %3954 = vst [vmem:[#allocation56_spill] sm:$0xff] %v2640_v38  ;;  %v2644_v54 = vmax.f32 %v1937_v49, 1e-06  ;;  %v508_v58 = vpop.f32.mrb[31].mxu0 }
 0x116   :  { %3955 = vst [vmem:[#allocation57_spill] sm:$0xff] %v2642_v46  ;;  %v2646_v62 = vmax.f32 %v508_v58, 1e-06 }
 0x117   :  { %3956 = vst [vmem:[#allocation58_spill] sm:$0xff] %v2644_v54 }
 0x118   :  { %3957 = vst [vmem:[#allocation59_spill] sm:$0xff] %v2646_v62 }
 0x11a   :  { %v1940_v0 = vpop.f32.mrb[32].mxu0 }
 0x11b   :  { %v2648_v6 = vmax.f32 %v1940_v0, 1e-06  ;;  %v521_v10 = vpop.f32.mrb[33].mxu0 }
 0x11c   :  { %v2650_v14 = vmax.f32 %v521_v10, 1e-06  ;;  %v1941_v17 = vpop.f32.mrb[34].mxu0 }
 0x11d   :  { %3958 = vst [vmem:[#allocation60_spill] sm:$0xff] %v2648_v6  ;;  %v2652_v22 = vmax.f32 %v1941_v17, 1e-06  ;;  %v524_v26 = vpop.f32.mrb[35].mxu0 }
 0x11e   :  { %3959 = vst [vmem:[#allocation61_spill] sm:$0xff] %v2650_v14  ;;  %v2654_v30 = vmax.f32 %v524_v26, 1e-06 }
 0x11f   :  { %3960 = vst [vmem:[#allocation62_spill] sm:$0xff] %v2652_v22 }
 0x120   :  { %3961 = vst [vmem:[#allocation63_spill] sm:$0xff] %v2654_v30 }
 0x122   :  { %v1944_v33 = vpop.f32.mrb[36].mxu0 }
 0x123   :  { %v2656_v42 = vmax.f32 %v1944_v33, 1e-06  ;;  %v537_v49 = vpop.f32.mrb[37].mxu0 }
 0x124   :  { %v2658_v12 = vmax.f32 %v537_v49, 1e-06  ;;  %v1945_v58 = vpop.f32.mrb[38].mxu0 }
 0x125   :  { %3962 = vst [vmem:[#allocation64_spill] sm:$0xff] %v2656_v42  ;;  %v2660_v4 = vmax.f32 %v1945_v58, 1e-06  ;;  %v540_v0 = vpop.f32.mrb[39].mxu0 }
 0x126   :  { %3963 = vst [vmem:[#allocation65_spill] sm:$0xff] %v2658_v12  ;;  %v2662_v16 = vmax.f32 %v540_v0, 1e-06 }
 0x127   :  { %3964 = vst [vmem:[#allocation66_spill] sm:$0xff] %v2660_v4 }
 0x128   :  { %3965 = vst [vmem:[#allocation67_spill] sm:$0xff] %v2662_v16 }
 0x12a   :  { %v1948_v10 = vpop.f32.mrb[40].mxu0  ;;  %718 = sbr.rel (!%p715_p0) target bundleno = 385 (0x181), region = 37 }
 0x12b   :  { %v2664_v8 = vmax.f32 %v1948_v10, 1e-06  ;;  %v553_v17 = vpop.f32.mrb[41].mxu0 }
 0x12c   :  { %v2666_v44 = vmax.f32 %v553_v17, 1e-06  ;;  %v1949_v26 = vpop.f32.mrb[42].mxu0 }
 0x12d   :  { %3966 = vst [vmem:[#allocation68_spill] sm:$0xff] %v2664_v8  ;;  %v2668_v36 = vmax.f32 %v1949_v26, 1e-06  ;;  %v556_v33 = vpop.f32.mrb[43].mxu0 }
 0x12e   :  { %3967 = vst [vmem:[#allocation69_spill] sm:$0xff] %v2666_v44  ;;  %v2670_v48 = vmax.f32 %v556_v33, 1e-06 }
 0x12f   :  { %3968 = vst [vmem:[#allocation70_spill] sm:$0xff] %v2668_v36 }
 0x130   :  { %3969 = vst [vmem:[#allocation71_spill] sm:$0xff] %v2670_v48 }
 0x131   :  { %v2676_v49 = vmul.f32 %v2546_v37, %v2546_v37  ;;  %v2680_v58 = vmul.f32 %v2550_v41, %v2550_v41  ;;  %v2684_v0 = vmul.f32 %v2544_v35, %v2544_v35  ;;  %v2688_v10 = vmul.f32 %v2548_v39, %v2548_v39 }
 0x132   :  { %v2692_v17 = vmul.f32 %v2554_v45, %v2554_v45  ;;  %v2696_v26 = vmul.f32 %v2558_v50, %v2558_v50  ;;  %v2700_v33 = vmul.f32 %v2552_v43, %v2552_v43  ;;  %v2704_v35 = vmul.f32 %v2556_v47, %v2556_v47 }
 0x133   :  { %v2708_v39 = vmul.f32 %v2570_v61, %v2570_v61  ;;  %v2712_v45 = vmul.f32 %v2574_v2, %v2574_v2  ;;  %v2716_v50 = vmul.f32 %v2568_v59, %v2568_v59  ;;  %v2720_v43 = vmul.f32 %v2572_v63, %v2572_v63 }
 0x134   :  { %v2724_v47 = vmul.f32 %v2586_v13, %v2586_v13  ;;  %v2728_v61 = vmul.f32 %v2590_v18, %v2590_v18  ;;  %v2732_v2 = vmul.f32 %v2584_v11, %v2584_v11  ;;  %v2736_v59 = vmul.f32 %v2588_v15, %v2588_v15 }
 0x135   :  { %v2740_v63 = vmul.f32 %v2602_v29, %v2602_v29  ;;  %v2744_v13 = vmul.f32 %v2606_v34, %v2606_v34  ;;  %v2748_v18 = vmul.f32 %v2600_v27, %v2600_v27  ;;  %v2752_v11 = vmul.f32 %v2604_v31, %v2604_v31 }
 0x136   :  { %v2756_v15 = vmul.f32 %v2618_v56, %v2618_v56  ;;  %v2760_v29 = vmul.f32 %v2622_v1, %v2622_v1  ;;  %v2764_v34 = vmul.f32 %v2616_v52, %v2616_v52  ;;  %v2768_v27 = vmul.f32 %v2620_v60, %v2620_v60 }
 0x137   :  { %v2772_v31 = vmul.f32 %v2634_v24, %v2634_v24  ;;  %v2776_v56 = vmul.f32 %v2638_v32, %v2638_v32  ;;  %v2780_v1 = vmul.f32 %v2632_v20, %v2632_v20  ;;  %v2784_v52 = vmul.f32 %v2636_v28, %v2636_v28 }
 0x138   :  { %v2788_v60 = vmul.f32 %v2642_v46, %v2642_v46  ;;  %v2792_v24 = vmul.f32 %v2646_v62, %v2646_v62  ;;  %v2796_v32 = vmul.f32 %v2640_v38, %v2640_v38  ;;  %v2800_v20 = vmul.f32 %v2644_v54, %v2644_v54 }
 0x139   :  { %v2804_v28 = vmul.f32 %v2650_v14, %v2650_v14  ;;  %v2808_v46 = vmul.f32 %v2654_v30, %v2654_v30  ;;  %v2812_v62 = vmul.f32 %v2648_v6, %v2648_v6  ;;  %v2816_v38 = vmul.f32 %v2652_v22, %v2652_v22 }
 0x13a   :  { %v2820_v54 = vmul.f32 %v2658_v12, %v2658_v12  ;;  %v2824_v14 = vmul.f32 %v2662_v16, %v2662_v16  ;;  %v2828_v30 = vmul.f32 %v2656_v42, %v2656_v42  ;;  %v2832_v6 = vmul.f32 %v2660_v4, %v2660_v4 }
 0x13b   :  { %v2836_v22 = vmul.f32 %v2666_v44, %v2666_v44  ;;  %v2840_v12 = vmul.f32 %v2670_v48, %v2670_v48  ;;  %v2844_v16 = vmul.f32 %v2664_v8, %v2664_v8  ;;  %v2848_v42 = vmul.f32 %v2668_v36, %v2668_v36 }
 0x13c   :  { %v2852_v4 = vmul.f32 %v2562_v53, %v2562_v53  ;;  %v2856_v44 = vmul.f32 %v2566_v57, %v2566_v57  ;;  %v2860_v48 = vmul.f32 %v2560_v51, %v2560_v51  ;;  %v2864_v8 = vmul.f32 %v2564_v55, %v2564_v55 }
 0x13d   :  { %v2868_v36 = vmul.f32 %v2578_v5, %v2578_v5  ;;  %v2872_v53 = vmul.f32 %v2582_v9, %v2582_v9  ;;  %v2876_v57 = vmul.f32 %v2576_v3, %v2576_v3  ;;  %v2880_v51 = vmul.f32 %v2580_v7, %v2580_v7 }
 0x13e   :  { %v2884_v55 = vmul.f32 %v2594_v21, %v2594_v21  ;;  %v2888_v5 = vmul.f32 %v2598_v25, %v2598_v25  ;;  %v2892_v9 = vmul.f32 %v2592_v19, %v2592_v19  ;;  %v2896_v3 = vmul.f32 %v2596_v23, %v2596_v23 }
 0x13f   :  { %3970 = vst [vmem:[#allocation72_spill] sm:$0xff] %v2880_v51  ;;  %v2900_v7 = vmul.f32 %v2610_v40, %v2610_v40  ;;  %v3976_v51 = vld [vmem:[#allocation43_spill] sm:$0xff]  ;;  %vm968_vm2 = vcmask 1041409   ;;  %vm970_vm3 = vcmask 1042434   ;;  %vm972_vm4 = vcmask 1043459  }
 0x140   :  { %3971 = vst [vmem:[#allocation73_spill] sm:$0xff] %v2884_v55  ;;  %3972 = vst [vmem:[#allocation74_spill] sm:$0xff] %v2888_v5  ;;  %v2904_v21 = vmul.f32 %v3976_v51, %v3976_v51  ;;  %v3978_v55 = vld [vmem:[#allocation40_spill] sm:$0xff]  ;;  %v3979_v5 = vld [vmem:[#allocation42_spill] sm:$0xff]  ;;  %vm974_vm5 = vcmask 1044484   ;;  %vm976_vm6 = vcmask 1045509  }
 0x141   :  { %3973 = vst [vmem:[#allocation75_spill] sm:$0xff] %v2892_v9  ;;  %3974 = vst [vmem:[#allocation76_spill] sm:$0xff] %v2896_v3  ;;  %v2908_v25 = vmul.f32 %v3978_v55, %v3978_v55  ;;  %v2912_v19 = vmul.f32 %v3979_v5, %v3979_v5  ;;  %v3980_v9 = vld [vmem:[#allocation49_spill] sm:$0xff]  ;;  %v3982_v3 = vld [vmem:[#allocation51_spill] sm:$0xff]  ;;  %v2932_v5 = vmul.f32 %v2676_v49, %v2546_v37  ;;  %vm978_vm7 = vcmask 1046534  }
 0x142   :  { %3975 = vst [vmem:[#allocation77_spill] sm:$0xff] %v2900_v7  ;;  %3977 = vst [vmem:[#allocation78_spill] sm:$0xff] %v2904_v21  ;;  %v2916_v23 = vmul.f32 %v3980_v9, %v3980_v9  ;;  %v2920_v40 = vmul.f32 %v3982_v3, %v3982_v3  ;;  %v3984_v7 = vld [vmem:[#allocation48_spill] sm:$0xff]  ;;  %v3986_v21 = vld [vmem:[#allocation50_spill] sm:$0xff]  ;;  %v2936_v9 = vmul.f32 %v2680_v58, %v2550_v41  ;;  %vm980_vm8 = vcmask 1047559  }
 0x143   :  { %v2924_v51 = vmul.f32 %v3984_v7, %v3984_v7  ;;  %v2928_v55 = vmul.f32 %v3986_v21, %v3986_v21  ;;  %v3993_v37 = vld [vmem:[#allocation12_spill] sm:$0xff]  ;;  %v3995_v41 = vld [vmem:[#allocation14_spill] sm:$0xff] }
 0x144   :  { %3981 = vst [vmem:[#allocation79_spill] sm:$0xff] %v2916_v23  ;;  %3983 = vst [vmem:[#allocation80_spill] sm:$0xff] %v2920_v40  ;;  %v3988_v23 = vld [vmem:[#allocation8_spill] sm:$0xff]  ;;  %v3989_v40 = vld [vmem:[#allocation10_spill] sm:$0xff]  ;;  %v2956_v58 = vmul.f32 %v2700_v33, %v3993_v37 }
 0x145   :  { %3985 = vst [vmem:[#allocation81_spill] sm:$0xff] %v2924_v51  ;;  %3987 = vst [vmem:[#allocation82_spill] sm:$0xff] %v2928_v55  ;;  %v2940_v3 = vmul.f32 %v2684_v0, %v3988_v23  ;;  %v2944_v7 = vmul.f32 %v2688_v10, %v3989_v40  ;;  %v3991_v51 = vld [vmem:[#allocation13_spill] sm:$0xff]  ;;  %v3992_v55 = vld [vmem:[#allocation15_spill] sm:$0xff]  ;;  %v2960_v23 = vmul.f32 %v2704_v35, %v3995_v41 }
 0x146   :  { %v2948_v21 = vmul.f32 %v2692_v17, %v3991_v51  ;;  %v2952_v49 = vmul.f32 %v2696_v26, %v3992_v55  ;;  %3994 = vst [vmem:[#allocation84_spill] sm:$0xff] %v2956_v58  ;;  %v3997_v0 = vld [vmem:[#allocation21_spill] sm:$0xff]  ;;  %v3998_v10 = vld [vmem:[#allocation23_spill] sm:$0xff]  ;;  %v3999_v51 = vld [vmem:[#allocation20_spill] sm:$0xff] }
 0x147   :  { %3990 = vst [vmem:[#allocation83_spill] sm:$0xff] %v2944_v7  ;;  %3996 = vst [vmem:[#allocation85_spill] sm:$0xff] %v2960_v23  ;;  %v791_v40 = vmul.f32 %v2708_v39, %v3997_v0  ;;  %v792_v7 = vmul.f32 %v2712_v45, %v3998_v10  ;;  %v2968_v17 = vmul.f32 %v2716_v50, %v3999_v51  ;;  %v4000_v55 = vld [vmem:[#allocation22_spill] sm:$0xff]  ;;  %v4001_v37 = vld [vmem:[#allocation29_spill] sm:$0xff] }
 0x148   :  { %v2972_v26 = vmul.f32 %v2720_v43, %v4000_v55  ;;  %v2976_v33 = vmul.f32 %v2724_v47, %v4001_v37  ;;  %v4002_v35 = vld [vmem:[#allocation31_spill] sm:$0xff]  ;;  %v4004_v39 = vld [vmem:[#allocation28_spill] sm:$0xff]  ;;  %v4006_v45 = vld [vmem:[#allocation30_spill] sm:$0xff] }
 0x149   :  { %v2980_v41 = vmul.f32 %v2728_v61, %v4002_v35  ;;  %v2984_v0 = vmul.f32 %v2732_v2, %v4004_v39  ;;  %v2988_v50 = vmul.f32 %v2736_v59, %v4006_v45  ;;  %v4008_v10 = vld [vmem:[#allocation37_spill] sm:$0xff]  ;;  %v4009_v51 = vld [vmem:[#allocation39_spill] sm:$0xff]  ;;  %v4010_v47 = vld [vmem:[#allocation36_spill] sm:$0xff] }
 0x14a   :  { %v799_v43 = vmul.f32 %v2740_v63, %v4008_v10  ;;  %v800_v55 = vmul.f32 %v2744_v13, %v4009_v51  ;;  %v801_v37 = vmul.f32 %v2748_v18, %v4010_v47  ;;  %v4011_v23 = vld [vmem:[#allocation38_spill] sm:$0xff]  ;;  %v4012_v35 = vld [vmem:[#allocation45_spill] sm:$0xff]  ;;  %v4013_v39 = vld [vmem:[#allocation47_spill] sm:$0xff] }
 0x14b   :  { %4003 = vst [vmem:[#allocation86_spill] sm:$0xff] %v2980_v41  ;;  %4005 = vst [vmem:[#allocation87_spill] sm:$0xff] %v2984_v0  ;;  %v2998_v61 = vmul.f32 %v2752_v11, %v4011_v23  ;;  %v3002_v2 = vmul.f32 %v2756_v15, %v4012_v35  ;;  %v3006_v59 = vmul.f32 %v2760_v29, %v4013_v39  ;;  %v4015_v45 = vld [vmem:[#allocation44_spill] sm:$0xff]  ;;  %v4017_v13 = vld [vmem:[#allocation46_spill] sm:$0xff] }
 0x14c   :  { %4007 = vst [vmem:[#allocation88_spill] sm:$0xff] %v2988_v50  ;;  %v3010_v63 = vmul.f32 %v2764_v34, %v4015_v45  ;;  %v3014_v10 = vmul.f32 %v2768_v27, %v4017_v13  ;;  %v4019_v18 = vld [vmem:[#allocation53_spill] sm:$0xff]  ;;  %v4020_v23 = vld [vmem:[#allocation55_spill] sm:$0xff]  ;;  %v4021_v15 = vld [vmem:[#allocation52_spill] sm:$0xff] }
 0x14d   :  { %4014 = vst [vmem:[#allocation89_spill] sm:$0xff] %v3006_v59  ;;  %v807_v11 = vmul.f32 %v2772_v31, %v4019_v18  ;;  %v808_v51 = vmul.f32 %v2776_v56, %v4020_v23  ;;  %v809_v47 = vmul.f32 %v2780_v1, %v4021_v15  ;;  %v4022_v35 = vld [vmem:[#allocation54_spill] sm:$0xff]  ;;  %v4023_v39 = vld [vmem:[#allocation57_spill] sm:$0xff]  ;;  %v4024_v45 = vld [vmem:[#allocation59_spill] sm:$0xff] }
 0x14e   :  { %4016 = vst [vmem:[#allocation90_spill] sm:$0xff] %v3010_v63  ;;  %4018 = vst [vmem:[#allocation91_spill] sm:$0xff] %v3014_v10  ;;  %v810_v29 = vmul.f32 %v2784_v52, %v4022_v35  ;;  %v3026_v34 = vmul.f32 %v2788_v60, %v4023_v39  ;;  %v3030_v27 = vmul.f32 %v2792_v24, %v4024_v45  ;;  %v4026_v13 = vld [vmem:[#allocation56_spill] sm:$0xff]  ;;  %v4028_v18 = vld [vmem:[#allocation58_spill] sm:$0xff] }
 0x14f   :  { %v3034_v31 = vmul.f32 %v2796_v32, %v4026_v13  ;;  %v3038_v56 = vmul.f32 %v2800_v20, %v4028_v18  ;;  %v4030_v1 = vld [vmem:[#allocation61_spill] sm:$0xff]  ;;  %v4031_v52 = vld [vmem:[#allocation63_spill] sm:$0xff]  ;;  %v4032_v60 = vld [vmem:[#allocation60_spill] sm:$0xff] }
 0x150   :  { %4025 = vst [vmem:[#allocation92_spill] sm:$0xff] %v3030_v27  ;;  %v815_v23 = vmul.f32 %v2804_v28, %v4030_v1  ;;  %v816_v15 = vmul.f32 %v2808_v46, %v4031_v52  ;;  %v817_v35 = vmul.f32 %v2812_v62, %v4032_v60  ;;  %v4033_v39 = vld [vmem:[#allocation62_spill] sm:$0xff]  ;;  %v4034_v45 = vld [vmem:[#allocation65_spill] sm:$0xff]  ;;  %v4035_v13 = vld [vmem:[#allocation67_spill] sm:$0xff] }
 0x151   :  { %4027 = vst [vmem:[#allocation93_spill] sm:$0xff] %v3034_v31  ;;  %4029 = vst [vmem:[#allocation94_spill] sm:$0xff] %v3038_v56  ;;  %v818_v24 = vmul.f32 %v2816_v38, %v4033_v39  ;;  %v819_v32 = vmul.f32 %v2820_v54, %v4034_v45  ;;  %v3052_v10 = vmul.f32 %v2824_v14, %v4035_v13  ;;  %v4037_v20 = vld [vmem:[#allocation64_spill] sm:$0xff]  ;;  %v4039_v28 = vld [vmem:[#allocation66_spill] sm:$0xff] }
 0x152   :  { %v3056_v18 = vmul.f32 %v2828_v30, %v4037_v20  ;;  %v3060_v46 = vmul.f32 %v2832_v6, %v4039_v28  ;;  %v4041_v1 = vld [vmem:[#allocation69_spill] sm:$0xff]  ;;  %v4042_v52 = vld [vmem:[#allocation71_spill] sm:$0xff]  ;;  %v4043_v60 = vld [vmem:[#allocation68_spill] sm:$0xff] }
 0x153   :  { %4036 = vst [vmem:[#allocation95_spill] sm:$0xff] %v3052_v10  ;;  %v823_v62 = vmul.f32 %v2836_v22, %v4041_v1  ;;  %v824_v38 = vmul.f32 %v2840_v12, %v4042_v52  ;;  %v825_v54 = vmul.f32 %v2844_v16, %v4043_v60  ;;  %v4044_v39 = vld [vmem:[#allocation70_spill] sm:$0xff]  ;;  %v4045_v45 = vld [vmem:[#allocation17_spill] sm:$0xff]  ;;  %v4046_v13 = vld [vmem:[#allocation19_spill] sm:$0xff]  ;;  %v899_v10 = vadd.f32 %v816_v15, %v815_v23 }
 0x154   :  { %4038 = vst [vmem:[#allocation96_spill] sm:$0xff] %v3056_v18  ;;  %4040 = vst [vmem:[#allocation97_spill] sm:$0xff] %v3060_v46  ;;  %v826_v14 = vmul.f32 %v2848_v42, %v4044_v39  ;;  %v827_v30 = vmul.f32 %v2852_v4, %v4045_v45  ;;  %v828_v20 = vmul.f32 %v2856_v44, %v4046_v13  ;;  %v4047_v6 = vld [vmem:[#allocation16_spill] sm:$0xff]  ;;  %v4049_v22 = vld [vmem:[#allocation18_spill] sm:$0xff] }
 0x155   :  { %v3076_v28 = vmul.f32 %v2860_v48, %v4047_v6  ;;  %v3080_v1 = vmul.f32 %v2864_v8, %v4049_v22  ;;  %v4051_v12 = vld [vmem:[#allocation25_spill] sm:$0xff]  ;;  %v4052_v52 = vld [vmem:[#allocation27_spill] sm:$0xff]  ;;  %v4053_v60 = vld [vmem:[#allocation24_spill] sm:$0xff] }
 0x156   :  { %v831_v16 = vmul.f32 %v2868_v36, %v4051_v12  ;;  %v832_v42 = vmul.f32 %v2872_v53, %v4052_v52  ;;  %v833_v4 = vmul.f32 %v2876_v57, %v4053_v60  ;;  %v4054_v39 = vld [vmem:[#allocation26_spill] sm:$0xff]  ;;  %v4055_v45 = vld [vmem:[#allocation72_spill] sm:$0xff]  ;;  %v4056_v13 = vld [vmem:[#allocation33_spill] sm:$0xff] }
 0x157   :  { %4048 = vst [vmem:[#allocation98_spill] sm:$0xff] %v3076_v28  ;;  %4050 = vst [vmem:[#allocation99_spill] sm:$0xff] %v3080_v1  ;;  %v834_v44 = vmul.f32 %v4055_v45, %v4054_v39  ;;  %v4057_v46 = vld [vmem:[#allocation73_spill] sm:$0xff]  ;;  %v4058_v6 = vld [vmem:[#allocation35_spill] sm:$0xff] }
 0x158   :  { %v835_v48 = vmul.f32 %v4057_v46, %v4056_v13  ;;  %v4059_v56 = vld [vmem:[#allocation74_spill] sm:$0xff]  ;;  %v4060_v8 = vld [vmem:[#allocation32_spill] sm:$0xff]  ;;  %v4061_v22 = vld [vmem:[#allocation75_spill] sm:$0xff] }
 0x159   :  { %v836_v50 = vmul.f32 %v4059_v56, %v4058_v6  ;;  %v837_v1 = vmul.f32 %v4061_v22, %v4060_v8  ;;  %v4062_v28 = vld [vmem:[#allocation34_spill] sm:$0xff]  ;;  %v4063_v36 = vld [vmem:[#allocation76_spill] sm:$0xff]  ;;  %v4065_v53 = vld [vmem:[#allocation41_spill] sm:$0xff] }
 0x15a   :  { %v3098_v12 = vmul.f32 %v4063_v36, %v4062_v28  ;;  %v4066_v52 = vld [vmem:[#allocation77_spill] sm:$0xff]  ;;  %v4067_v57 = vld [vmem:[#allocation43_spill] sm:$0xff]  ;;  %v4068_v60 = vld [vmem:[#allocation78_spill] sm:$0xff] }
 0x15b   :  { %v839_v18 = vmul.f32 %v4066_v52, %v4065_v53  ;;  %v840_v31 = vmul.f32 %v4068_v60, %v4067_v57  ;;  %v4069_v39 = vld [vmem:[#allocation40_spill] sm:$0xff]  ;;  %v4070_v46 = vld [vmem:[#allocation42_spill] sm:$0xff]  ;;  %v4071_v56 = vld [vmem:[#allocation49_spill] sm:$0xff]  ;;  %v847_v57 = vadd.f32 %v2936_v9, %v2932_v5  ;;  %v860_v60 = vadd.f32 %v792_v7, %v791_v40 }
 0x15c   :  { %4064 = vst [vmem:[#allocation72_spill] sm:$0xff] %v3098_v12  ;;  %v841_v45 = vmul.f32 %v2908_v25, %v4069_v39  ;;  %v842_v13 = vmul.f32 %v2912_v19, %v4070_v46  ;;  %v4072_v6 = vld [vmem:[#allocation79_spill] sm:$0xff]  ;;  %v4074_v22 = vld [vmem:[#allocation80_spill] sm:$0xff]  ;;  %v4076_v36 = vld [vmem:[#allocation81_spill] sm:$0xff]  ;;  %v873_v25 = vadd.f32 %v800_v55, %v799_v43  ;;  %v886_v39 = vadd.f32 %v808_v51, %v807_v11 }
 0x15d   :  { %v843_v63 = vmul.f32 %v4072_v6, %v4071_v56  ;;  %v4073_v8 = vld [vmem:[#allocation51_spill] sm:$0xff]  ;;  %v4075_v28 = vld [vmem:[#allocation48_spill] sm:$0xff]  ;;  %v4077_v58 = vld [vmem:[#allocation50_spill] sm:$0xff]  ;;  %v912_v19 = vadd.f32 %v824_v38, %v823_v62  ;;  %v925_v46 = vadd.f32 %v832_v42, %v831_v16  ;;  %v938_v27 = vadd.f32 %v840_v31, %v839_v18 }
 0x15e   :  { %v844_v0 = vmul.f32 %v4074_v22, %v4073_v8  ;;  %v845_v12 = vmul.f32 %v4076_v36, %v4075_v28  ;;  %v4078_v53 = vld [vmem:[#allocation82_spill] sm:$0xff]  ;;  %v848_v56 = vadd.f32 %v847_v57, %v2940_v3  ;;  %v861_v6 = vadd.f32 %v860_v60, %v2968_v17  ;;  %v4081_v23 = vld [vmem:[#allocation89_spill] sm:$0xff] }
 0x15f   :  { %v846_v52 = vmul.f32 %v4078_v53, %v4077_v58  ;;  %v874_v8 = vadd.f32 %v873_v25, %v801_v37  ;;  %v887_v22 = vadd.f32 %v886_v39, %v809_v47  ;;  %v900_v28 = vadd.f32 %v899_v10, %v817_v35  ;;  %v4079_v53 = vld [vmem:[#allocation83_spill] sm:$0xff]  ;;  %v4086_v38 = vld [vmem:[#allocation90_spill] sm:$0xff]  ;;  %v4094_v25 = vld [vmem:[#allocation97_spill] sm:$0xff] }
 0x160   :  { %v913_v36 = vadd.f32 %v912_v19, %v825_v54  ;;  %v926_v59 = vadd.f32 %v925_v46, %v833_v4  ;;  %v939_v58 = vadd.f32 %v938_v27, %v841_v45  ;;  %v849_v41 = vadd.f32 %v848_v56, %v4079_v53  ;;  %v4089_v16 = vld [vmem:[#allocation98_spill] sm:$0xff]  ;;  %v4095_v19 = vld [vmem:[#allocation99_spill] sm:$0xff] }
 0x161   :  { %v862_v5 = vadd.f32 %v861_v6, %v2972_v26  ;;  %v875_v7 = vadd.f32 %v874_v8, %v2998_v61  ;;  %v888_v9 = vadd.f32 %v887_v22, %v810_v29  ;;  %v901_v40 = vadd.f32 %v900_v28, %v818_v24  ;;  %v4080_v61 = vld [vmem:[#allocation86_spill] sm:$0xff]  ;;  %v4083_v24 = vld [vmem:[#allocation95_spill] sm:$0xff] }
 0x162   :  { %v914_v43 = vadd.f32 %v913_v36, %v826_v14  ;;  %v927_v55 = vadd.f32 %v926_v59, %v834_v44  ;;  %v940_v11 = vadd.f32 %v939_v58, %v842_v13  ;;  %v850_v3 = vadd.f32 %v849_v41, %v2948_v21  ;;  %v4082_v59 = vld [vmem:[#allocation92_spill] sm:$0xff]  ;;  %v4093_v57 = vld [vmem:[#allocation94_spill] sm:$0xff] }
 0x163   :  { %v863_v17 = vadd.f32 %v862_v5, %v2976_v33  ;;  %v876_v37 = vadd.f32 %v875_v7, %v3002_v2  ;;  %v889_v10 = vadd.f32 %v888_v9, %v3026_v34  ;;  %v902_v51 = vadd.f32 %v901_v40, %v819_v32  ;;  %v4084_v2 = vld [vmem:[#allocation84_spill] sm:$0xff]  ;;  %v4085_v34 = vld [vmem:[#allocation87_spill] sm:$0xff] }
 0x164   :  { %v915_v47 = vadd.f32 %v914_v43, %v827_v30  ;;  %v928_v27 = vadd.f32 %v927_v55, %v835_v48  ;;  %v941_v31 = vadd.f32 %v940_v11, %v843_v63  ;;  %v851_v26 = vadd.f32 %v850_v3, %v2952_v49  ;;  %v4087_v63 = vld [vmem:[#allocation93_spill] sm:$0xff]  ;;  %v4088_v49 = vld [vmem:[#allocation96_spill] sm:$0xff] }
 0x165   :  { %v864_v29 = vadd.f32 %v863_v17, %v4080_v61  ;;  %v877_v15 = vadd.f32 %v876_v37, %v4081_v23  ;;  %v890_v35 = vadd.f32 %v889_v10, %v4082_v59  ;;  %v903_v21 = vadd.f32 %v902_v51, %v4083_v24  ;;  %v4090_v48 = vld [vmem:[#allocation85_spill] sm:$0xff]  ;;  %v4091_v13 = vld [vmem:[#allocation88_spill] sm:$0xff] }
 0x166   :  { %v916_v41 = vadd.f32 %v915_v47, %v828_v20  ;;  %v929_v33 = vadd.f32 %v928_v27, %v836_v50  ;;  %v942_v18 = vadd.f32 %v941_v31, %v844_v0  ;;  %v852_v62 = vadd.f32 %v851_v26, %v4084_v2  ;;  %v4092_v50 = vld [vmem:[#allocation91_spill] sm:$0xff]  ;;  %v4096_v56 = vld [vmem:[#allocation72_spill] sm:$0xff] }
 0x167   :  { %v865_v32 = vadd.f32 %v864_v29, %v4085_v34  ;;  %v878_v54 = vadd.f32 %v877_v15, %v4086_v38  ;;  %v891_v14 = vadd.f32 %v890_v35, %v4087_v63  ;;  %v904_v30 = vadd.f32 %v903_v21, %v4088_v49 }
 0x168   :  { %v917_v42 = vadd.f32 %v916_v41, %v4089_v16  ;;  %v930_v4 = vadd.f32 %v929_v33, %v837_v1  ;;  %v943_v44 = vadd.f32 %v942_v18, %v845_v12  ;;  %v853_v45 = vadd.f32 %v852_v62, %v4090_v48 }
 0x169   :  { %v866_v20 = vadd.f32 %v865_v32, %v4091_v13  ;;  %v879_v0 = vadd.f32 %v878_v54, %v4092_v50  ;;  %v892_v60 = vadd.f32 %v891_v14, %v4093_v57  ;;  %v905_v39 = vadd.f32 %v904_v30, %v4094_v25 }
 0x16a   :  { %v918_v46 = vadd.f32 %v917_v42, %v4095_v19  ;;  %v931_v6 = vadd.f32 %v930_v4, %v4096_v56  ;;  %v944_v8 = vadd.f32 %v943_v44, %v846_v52  ;;  %v854_v22 = vrot.slane %v853_v45, 4 }
 0x16b   :  { %v867_v28 = vrot.slane %v866_v20, 4  ;;  %v880_v36 = vrot.slane %v879_v0, 4  ;;  %v893_v1 = vrot.slane %v892_v60, 4  ;;  %v906_v12 = vrot.slane %v905_v39, 4 }
 0x16c   :  { %v919_v58 = vrot.slane %v918_v46, 4  ;;  %v932_v53 = vrot.slane %v931_v6, 4  ;;  %v945_v5 = vrot.slane %v944_v8, 4  ;;  %v855_v7 = vadd.f32 %v854_v22, %v853_v45 }
 0x16d   :  { %v868_v9 = vadd.f32 %v867_v28, %v866_v20  ;;  %v881_v40 = vadd.f32 %v880_v36, %v879_v0  ;;  %v894_v43 = vadd.f32 %v893_v1, %v892_v60  ;;  %v907_v55 = vadd.f32 %v906_v12, %v905_v39 }
 0x16e   :  { %v920_v11 = vadd.f32 %v919_v58, %v918_v46  ;;  %v933_v3 = vadd.f32 %v932_v53, %v931_v6  ;;  %v946_v17 = vadd.f32 %v945_v5, %v944_v8  ;;  %v856_v37 = vrot.slane %v855_v7, 2 }
 0x16f   :  { %v869_v10 = vrot.slane %v868_v9, 2  ;;  %v882_v51 = vrot.slane %v881_v40, 2  ;;  %v895_v52 = vrot.slane %v894_v43, 2  ;;  %v908_v47 = vrot.slane %v907_v55, 2 }
 0x170   :  { %v921_v27 = vrot.slane %v920_v11, 2  ;;  %v934_v31 = vrot.slane %v933_v3, 2  ;;  %v947_v26 = vrot.slane %v946_v17, 2  ;;  %v857_v61 = vadd.f32 %v856_v37, %v855_v7 }
 0x171   :  { %v870_v29 = vadd.f32 %v869_v10, %v868_v9  ;;  %v883_v23 = vadd.f32 %v882_v51, %v881_v40  ;;  %v896_v15 = vadd.f32 %v895_v52, %v894_v43  ;;  %v909_v59 = vadd.f32 %v908_v47, %v907_v55 }
 0x172   :  { %v922_v35 = vadd.f32 %v921_v27, %v920_v11  ;;  %v935_v24 = vadd.f32 %v934_v31, %v933_v3  ;;  %v948_v21 = vadd.f32 %v947_v26, %v946_v17  ;;  %v858_v41 = vrot.slane %v857_v61, 1 }
 0x173   :  { %v871_v33 = vrot.slane %v870_v29, 1  ;;  %v884_v18 = vrot.slane %v883_v23, 1  ;;  %v897_v2 = vrot.slane %v896_v15, 1  ;;  %v910_v62 = vrot.slane %v909_v59, 1 }
 0x174   :  { %v923_v34 = vrot.slane %v922_v35, 1  ;;  %v936_v32 = vrot.slane %v935_v24, 1  ;;  %v949_v38 = vrot.slane %v948_v21, 1  ;;  %v859_v54 = vadd.f32 %v858_v41, %v857_v61 }
 0x175   :  { %v872_v63 = vadd.f32 %v871_v33, %v870_v29  ;;  %v885_v14 = vadd.f32 %v884_v18, %v883_v23  ;;  %v898_v49 = vadd.f32 %v897_v2, %v896_v15  ;;  %v911_v30 = vadd.f32 %v910_v62, %v909_v59 }
 0x176   :  { %v924_v16 = vadd.f32 %v923_v34, %v922_v35  ;;  %v937_v42 = vadd.f32 %v936_v32, %v935_v24  ;;  %v952_v4 = vmul.f32 0.015625, %v859_v54  ;;  %v950_v45 = vadd.f32 %v949_v38, %v948_v21 }
 0x177   :  { %v953_v44 = vmul.f32 0.015625, %v872_v63  ;;  %v954_v48 = vmul.f32 0.015625, %v885_v14  ;;  %v955_v13 = vmul.f32 0.015625, %v898_v49  ;;  %v956_v20 = vmul.f32 0.015625, %v911_v30 }
 0x178   :  { %v957_v50 = vmul.f32 0.015625, %v924_v16  ;;  %v958_v57 = vmul.f32 0.015625, %v937_v42  ;;  %v959_v25 = vmul.f32 0.015625, %v950_v45 }
 0x179   :  { %v969_v0 = vsel %vm968_vm2, %v953_v44, %v952_v4 }
 0x17a   :  { %v971_v60 = vsel %vm970_vm3, %v954_v48, %v969_v0 }
 0x17b   :  { %v973_v39 = vsel %vm972_vm4, %v955_v13, %v971_v60 }
 0x17c   :  { %v975_v19 = vsel %vm974_vm5, %v956_v20, %v973_v39 }
 0x17d   :  { %v977_v46 = vsel %vm976_vm6, %v957_v50, %v975_v19 }
 0x17e   :  { %v979_v56 = vsel %vm978_vm7, %v958_v57, %v977_v46 }
 0x17f   :  { %v981_v6 = vsel %vm980_vm8, %v959_v25, %v979_v56 }
 0x180   :  { %983 = vst [vmem:[#allocation2] sm:$0xff] %v981_v6 }
 0x181 PF:  { %986 = sbr.rel (%p715_p0) target bundleno = 555 (0x22b), region = 41 }
 0x188   :  { %v4097_v8 = vld [vmem:[#allocation9_spill] sm:$0xff]  ;;  %v4098_v22 = vld [vmem:[#allocation11_spill] sm:$0xff]  ;;  %v4099_v28 = vld [vmem:[#allocation8_spill] sm:$0xff]  ;;  %vm1429_vm9 = vcmask 1041409   ;;  %vm1431_vm10 = vcmask 1042434   ;;  %vm1433_vm11 = vcmask 1043459  }
 0x189   :  { %2052 = vlog2.f32 %v4097_v8  ;;  %v4100_v36 = vld [vmem:[#allocation10_spill] sm:$0xff]  ;;  %v4101_v1 = vld [vmem:[#allocation13_spill] sm:$0xff]  ;;  %v4102_v12 = vld [vmem:[#allocation15_spill] sm:$0xff]  ;;  %vm1435_vm12 = vcmask 1044484   ;;  %vm1437_vm13 = vcmask 1045509   ;;  %vm1439_vm14 = vcmask 1046534  }
 0x18a   :  { %2054 = vlog2.f32 %v4098_v22  ;;  %v4103_v58 = vld [vmem:[#allocation12_spill] sm:$0xff]  ;;  %v4104_v53 = vld [vmem:[#allocation14_spill] sm:$0xff]  ;;  %v4105_v5 = vld [vmem:[#allocation21_spill] sm:$0xff]  ;;  %vm1441_vm15 = vcmask 1047559  }
 0x18b   :  { %2056 = vlog2.f32 %v4099_v28  ;;  %v4106_v7 = vld [vmem:[#allocation23_spill] sm:$0xff]  ;;  %v4107_v40 = vld [vmem:[#allocation20_spill] sm:$0xff]  ;;  %v4108_v55 = vld [vmem:[#allocation22_spill] sm:$0xff] }
 0x18c   :  { %2058 = vlog2.f32 %v4100_v36  ;;  %v4109_v3 = vld [vmem:[#allocation29_spill] sm:$0xff]  ;;  %v4110_v37 = vld [vmem:[#allocation31_spill] sm:$0xff]  ;;  %v4111_v51 = vld [vmem:[#allocation28_spill] sm:$0xff] }
 0x18d   :  { %2060 = vlog2.f32 %v4101_v1  ;;  %v4112_v47 = vld [vmem:[#allocation30_spill] sm:$0xff]  ;;  %v4113_v31 = vld [vmem:[#allocation37_spill] sm:$0xff]  ;;  %v4114_v61 = vld [vmem:[#allocation39_spill] sm:$0xff] }
 0x18e   :  { %2062 = vlog2.f32 %v4102_v12  ;;  %v4115_v23 = vld [vmem:[#allocation36_spill] sm:$0xff]  ;;  %v4116_v59 = vld [vmem:[#allocation38_spill] sm:$0xff]  ;;  %v4117_v24 = vld [vmem:[#allocation45_spill] sm:$0xff] }
 0x18f   :  { %2064 = vlog2.f32 %v4103_v58  ;;  %v4118_v41 = vld [vmem:[#allocation47_spill] sm:$0xff]  ;;  %v4119_v18 = vld [vmem:[#allocation44_spill] sm:$0xff]  ;;  %v4120_v62 = vld [vmem:[#allocation46_spill] sm:$0xff] }
 0x190   :  { %2066 = vlog2.f32 %v4104_v53  ;;  %v4121_v32 = vld [vmem:[#allocation53_spill] sm:$0xff]  ;;  %v4122_v54 = vld [vmem:[#allocation55_spill] sm:$0xff]  ;;  %v4123_v14 = vld [vmem:[#allocation52_spill] sm:$0xff] }
 0x191   :  { %2068 = vlog2.f32 %v4105_v5  ;;  %v4124_v30 = vld [vmem:[#allocation54_spill] sm:$0xff]  ;;  %v4125_v42 = vld [vmem:[#allocation57_spill] sm:$0xff]  ;;  %v4126_v44 = vld [vmem:[#allocation59_spill] sm:$0xff] }
 0x192   :  { %2070 = vlog2.f32 %v4106_v7  ;;  %v4127_v45 = vld [vmem:[#allocation56_spill] sm:$0xff]  ;;  %v4128_v20 = vld [vmem:[#allocation58_spill] sm:$0xff]  ;;  %v4129_v0 = vld [vmem:[#allocation61_spill] sm:$0xff] }
 0x193   :  { %v2053_v9 = vpop.eup %2052  ;;  %2072 = vlog2.f32 %v4107_v40  ;;  %v4130_v60 = vld [vmem:[#allocation63_spill] sm:$0xff]  ;;  %v4131_v39 = vld [vmem:[#allocation60_spill] sm:$0xff]  ;;  %v4132_v46 = vld [vmem:[#allocation62_spill] sm:$0xff] }
 0x194   :  { %v2055_v43 = vpop.eup %2054  ;;  %2074 = vlog2.f32 %v4108_v55  ;;  %v4133_v6 = vld [vmem:[#allocation65_spill] sm:$0xff]  ;;  %v4134_v22 = vld [vmem:[#allocation67_spill] sm:$0xff]  ;;  %v4135_v36 = vld [vmem:[#allocation64_spill] sm:$0xff]  ;;  %v988_v53 = vmul.f32 0.6931472, %v2053_v9 }
 0x195   :  { %v3159_v11 = vpop.eup %2056  ;;  %2076 = vlog2.f32 %v4109_v3  ;;  %v4136_v12 = vld [vmem:[#allocation66_spill] sm:$0xff]  ;;  %v4137_v5 = vld [vmem:[#allocation69_spill] sm:$0xff]  ;;  %v990_v40 = vmul.f32 0.6931472, %v2055_v43  ;;  %v4138_v55 = vld [vmem:[#allocation71_spill] sm:$0xff]  ;;  %v3252_v3 = vstv %s3833_s0 }
 0x196   :  { %v3162_v17 = vpop.eup %2058  ;;  %2078 = vlog2.f32 %v4110_v37  ;;  %v992_v9 = vmul.f32 0.6931472, %v3159_v11 }
 0x197   :  { %v3165_v10 = vpop.eup %2060  ;;  %2080 = vlog2.f32 %v4111_v51  ;;  %v4139_v51 = vld [vmem:[#allocation68_spill] sm:$0xff]  ;;  %v1117_v11 = vmul.f32 %v3252_v3, %v990_v40 }
 0x198   :  { %v3168_v52 = vpop.eup %2062  ;;  %2082 = vlog2.f32 %v4112_v47 }
 0x199   :  { %v3171_v27 = vpop.eup %2064  ;;  %2084 = vlog2.f32 %v4113_v31  ;;  %v994_v31 = vmul.f32 0.6931472, %v3162_v17 }
 0x19a   :  { %v3174_v26 = vpop.eup %2066  ;;  %2086 = vlog2.f32 %v4114_v61  ;;  %v4140_v61 = vld [vmem:[#allocation70_spill] sm:$0xff]  ;;  %v1000_v17 = vmul.f32 0.6931472, %v3171_v27 }
 0x19b   :  { %v3177_v29 = vpop.eup %2068  ;;  %2088 = vlog2.f32 %v4115_v23  ;;  %v996_v23 = vmul.f32 0.6931472, %v3165_v10  ;;  %v1002_v10 = vmul.f32 0.6931472, %v3174_v26 }
 0x19c   :  { %v3180_v15 = vpop.eup %2070  ;;  %2090 = vlog2.f32 %v4116_v59  ;;  %v998_v59 = vmul.f32 0.6931472, %v3168_v52  ;;  %v4144_v52 = vld [vmem:[#allocation18_spill] sm:$0xff]  ;;  %v1004_v26 = vmul.f32 0.6931472, %v3177_v29 }
 0x19d   :  { %v3183_v35 = vpop.eup %2072  ;;  %2092 = vlog2.f32 %v4117_v24  ;;  %v4141_v24 = vld [vmem:[#allocation17_spill] sm:$0xff]  ;;  %v1123_v29 = vmul.f32 %v3252_v3, %v1002_v10 }
 0x19e   :  { %v3186_v21 = vpop.eup %2074  ;;  %2094 = vlog2.f32 %v4118_v41  ;;  %v1116_v41 = vmul.f32 %v3252_v3, %v988_v53  ;;  %v1121_v27 = vmul.f32 %v3252_v3, %v998_v59  ;;  %v4147_v53 = vld [vmem:[#allocation24_spill] sm:$0xff] }
 0x19f   :  { %v3189_v33 = vpop.eup %2076  ;;  %2096 = vlog2.f32 %v4119_v18 }
 0x1a0   :  { %v3192_v2 = vpop.eup %2078  ;;  %2098 = vlog2.f32 %v4120_v62  ;;  %v4142_v62 = vld [vmem:[#allocation19_spill] sm:$0xff] }
 0x1a1   :  { %v3195_v34 = vpop.eup %2080  ;;  %2100 = vlog2.f32 %v4121_v32  ;;  %v1014_v59 = vmul.f32 0.6931472, %v3192_v2 }
 0x1a2   :  { %v3198_v38 = vpop.eup %2082  ;;  %2102 = vlog2.f32 %v4122_v54  ;;  %v4143_v54 = vld [vmem:[#allocation16_spill] sm:$0xff]  ;;  %v1016_v2 = vmul.f32 0.6931472, %v3195_v34 }
 0x1a3   :  { %v3201_v63 = vpop.eup %2084  ;;  %2104 = vlog2.f32 %v4123_v14  ;;  %v1129_v34 = vmul.f32 %v3252_v3, %v1014_v59 }
 0x1a4   :  { %v3204_v49 = vpop.eup %2086  ;;  %2106 = vlog2.f32 %v4124_v30  ;;  %v1118_v30 = vmul.f32 %v3252_v3, %v992_v9  ;;  %v1130_v59 = vmul.f32 %v3252_v3, %v1016_v2 }
 0x1a5   :  { %v3207_v16 = vpop.eup %2088  ;;  %2108 = vlog2.f32 %v4125_v42  ;;  %v1119_v42 = vmul.f32 %v3252_v3, %v994_v31  ;;  %v4149_v31 = vld [vmem:[#allocation33_spill] sm:$0xff]  ;;  %v3378_v2 = vmul.f32 1.442695, %v1129_v34 }
 0x1a6   :  { %v3210_v4 = vpop.eup %2090  ;;  %2110 = vlog2.f32 %v4126_v44 }
 0x1a7   :  { %v3213_v48 = vpop.eup %2092  ;;  %2112 = vlog2.f32 %v4127_v45  ;;  %v4145_v45 = vld [vmem:[#allocation25_spill] sm:$0xff] }
 0x1a8   :  { %v3216_v13 = vpop.eup %2094  ;;  %2114 = vlog2.f32 %v4128_v20  ;;  %v1120_v20 = vmul.f32 %v3252_v3, %v996_v23 }
 0x1a9   :  { %v3219_v50 = vpop.eup %2096  ;;  %2116 = vlog2.f32 %v4129_v0  ;;  %v3287_v0 = vmul.f32 1.442695, %v1116_v41  ;;  %v1124_v41 = vmul.f32 %v3252_v3, %v1004_v26  ;;  %v1022_v26 = vmul.f32 0.6931472, %v3204_v49 }
 0x1aa   :  { %v3222_v57 = vpop.eup %2098  ;;  %2118 = vlog2.f32 %v4130_v60 }
 0x1ab   :  { %v3225_v25 = vpop.eup %2100  ;;  %2120 = vlog2.f32 %v4131_v39  ;;  %v1006_v39 = vmul.f32 0.6931472, %v3180_v15  ;;  %v3306_v15 = vmul.f32 1.442695, %v1118_v30  ;;  %v1018_v30 = vmul.f32 0.6931472, %v3198_v38 }
 0x1ac   :  { %v3228_v19 = vpop.eup %2102  ;;  %2122 = vlog2.f32 %v4132_v46  ;;  %v4146_v46 = vld [vmem:[#allocation27_spill] sm:$0xff]  ;;  %v3348_v38 = vmul.f32 1.442695, %v1124_v41 }
 0x1ad   :  { %v3231_v56 = vpop.eup %2104  ;;  %2124 = vlog2.f32 %v4133_v6  ;;  %v3294_v6 = vmul.f32 1.442695, %v1117_v11  ;;  %v1131_v41 = vmul.f32 %v3252_v3, %v1018_v30 }
 0x1ae   :  { %v3234_v8 = vpop.eup %2106  ;;  %2126 = vlog2.f32 %v4134_v22 }
 0x1af   :  { %v3237_v28 = vpop.eup %2108  ;;  %2128 = vlog2.f32 %v4135_v36  ;;  %v1008_v36 = vmul.f32 0.6931472, %v3183_v35  ;;  %v1012_v35 = vmul.f32 0.6931472, %v3189_v33  ;;  %v3392_v34 = vmul.f32 1.442695, %v1131_v41 }
 0x1b0   :  { %v3240_v1 = vpop.eup %2110  ;;  %2130 = vlog2.f32 %v4136_v12  ;;  %v1010_v12 = vmul.f32 0.6931472, %v3186_v21  ;;  %v3314_v21 = vmul.f32 1.442695, %v1120_v20 }
 0x1b1   :  { %v3243_v58 = vpop.eup %2112  ;;  %2132 = vlog2.f32 %v4137_v5  ;;  %v1122_v5 = vmul.f32 %v3252_v3, %v1000_v17  ;;  %v4151_v17 = vld [vmem:[#allocation32_spill] sm:$0xff]  ;;  %v1126_v33 = vmul.f32 %v3252_v3, %v1008_v36 }
 0x1b2   :  { %v3246_v7 = vpop.eup %2114  ;;  %2134 = vlog2.f32 %v4138_v55  ;;  %v4148_v55 = vld [vmem:[#allocation26_spill] sm:$0xff] }
 0x1b3   :  { %v3254_v37 = vpop.eup %2116  ;;  %2136 = vlog2.f32 %v4139_v51  ;;  %v3308_v51 = vmul.f32 1.442695, %v1119_v42  ;;  %v3329_v10 = vmul.f32 1.442695, %v1122_v5  ;;  %v4152_v42 = vld [vmem:[#allocation34_spill] sm:$0xff] }
 0x1b4   :  { %v3257_v47 = vpop.eup %2118  ;;  %2138 = vlog2.f32 %v4140_v61  ;;  %v3316_v61 = vmul.f32 1.442695, %v1121_v27  ;;  %v1020_v27 = vmul.f32 0.6931472, %v3201_v63  ;;  %v1024_v63 = vmul.f32 0.6931472, %v3207_v16 }
 0x1b5   :  { %v3262_v43 = vpop.eup %2120  ;;  %2140 = vlog2.f32 %v4141_v24  ;;  %v4150_v24 = vld [vmem:[#allocation35_spill] sm:$0xff]  ;;  %v3356_v49 = vmul.f32 1.442695, %v1126_v33  ;;  %v1133_v33 = vmul.f32 %v3252_v3, %v1022_v26 }
 0x1b6   :  { %v3268_v18 = vpop.eup %2122  ;;  %2142 = vlog2.f32 %v4142_v62  ;;  %v1125_v62 = vmul.f32 %v3252_v3, %v1006_v39  ;;  %v4153_v39 = vld [vmem:[#allocation41_spill] sm:$0xff]  ;;  %v1132_v16 = vmul.f32 %v3252_v3, %v1020_v27  ;;  %v1034_v27 = vmul.f32 0.6931472, %v3222_v57 }
 0x1b7   :  { %v3272_v32 = vpop.eup %2124  ;;  %2144 = vlog2.f32 %v4143_v54  ;;  %v1127_v54 = vmul.f32 %v3252_v3, %v1010_v12  ;;  %v4154_v12 = vld [vmem:[#allocation43_spill] sm:$0xff]  ;;  %v1134_v26 = vmul.f32 %v3252_v3, %v1024_v63 }
 0x1b8   :  { %v3276_v14 = vpop.eup %2126  ;;  %2146 = vlog2.f32 %v4144_v52  ;;  %v3398_v57 = vmul.f32 1.442695, %v1132_v16 }
 0x1b9   :  { %v3282_v44 = vpop.eup %2128  ;;  %2148 = vlog2.f32 %v4145_v45  ;;  %v3336_v45 = vmul.f32 1.442695, %v1123_v29  ;;  %v3358_v29 = vmul.f32 1.442695, %v1127_v54  ;;  %v3413_v16 = vmul.f32 1.442695, %v1134_v26 }
 0x1ba   :  { %v3289_v60 = vpop.eup %2130  ;;  %2150 = vlog2.f32 %v4146_v46  ;;  %v1128_v46 = vmul.f32 %v3252_v3, %v1012_v35 }
 0x1bb   :  { %v3296_v22 = vpop.eup %2132  ;;  %2152 = vlog2.f32 %v4147_v53  ;;  %v3350_v53 = vmul.f32 1.442695, %v1125_v62 }
 0x1bc   :  { %v3302_v40 = vpop.eup %2134  ;;  %2154 = vlog2.f32 %v4148_v55  ;;  %v4155_v55 = vld [vmem:[#allocation40_spill] sm:$0xff]  ;;  %v3371_v54 = vmul.f32 1.442695, %v1128_v46 }
 0x1bd   :  { %v3310_v9 = vpop.eup %2136  ;;  %2156 = vlog2.f32 %v4149_v31  ;;  %v1026_v31 = vmul.f32 0.6931472, %v3210_v4  ;;  %v1028_v4 = vmul.f32 0.6931472, %v3213_v48 }
 0x1be   :  { %v3318_v23 = vpop.eup %2138  ;;  %2158 = vlog2.f32 %v4150_v24  ;;  %v4156_v24 = vld [vmem:[#allocation42_spill] sm:$0xff] }
 0x1bf   :  { %v3324_v11 = vpop.eup %2140  ;;  %2160 = vlog2.f32 %v4151_v17  ;;  %v4157_v17 = vld [vmem:[#allocation49_spill] sm:$0xff]  ;;  %v1135_v48 = vmul.f32 %v3252_v3, %v1026_v31  ;;  %v1136_v31 = vmul.f32 %v3252_v3, %v1028_v4  ;;  %v1042_v4 = vmul.f32 0.6931472, %v3234_v8 }
 0x1c0   :  { %v3331_v52 = vpop.eup %2142  ;;  %2162 = vlog2.f32 %v4152_v42 }
 0x1c1   :  { %v3338_v20 = vpop.eup %2144  ;;  %2164 = vlog2.f32 %v4153_v39  ;;  %v1030_v39 = vmul.f32 0.6931472, %v3216_v13  ;;  %v3390_v13 = vmul.f32 1.442695, %v1130_v59  ;;  %v3432_v8 = vmul.f32 1.442695, %v1136_v31 }
 0x1c2   :  { %v3344_v36 = vpop.eup %2146  ;;  %2166 = vlog2.f32 %v4154_v12  ;;  %v4158_v12 = vld [vmem:[#allocation51_spill] sm:$0xff]  ;;  %v1143_v31 = vmul.f32 %v3252_v3, %v1042_v4 }
 0x1c3   :  { %v3352_v5 = vpop.eup %2148  ;;  %2168 = vlog2.f32 %v4155_v55  ;;  %v1032_v55 = vmul.f32 0.6931472, %v3219_v50  ;;  %v1036_v50 = vmul.f32 0.6931472, %v3225_v25  ;;  %v1137_v59 = vmul.f32 %v3252_v3, %v1030_v39 }
 0x1c4   :  { %v3360_v35 = vpop.eup %2150  ;;  %2170 = vlog2.f32 %v4156_v24  ;;  %v4159_v24 = vld [vmem:[#allocation48_spill] sm:$0xff]  ;;  %v3420_v39 = vmul.f32 1.442695, %v1135_v48 }
 0x1c5   :  { %v3366_v62 = vpop.eup %2152  ;;  %2172 = vlog2.f32 %v4157_v17  ;;  %v4160_v17 = vld [vmem:[#allocation50_spill] sm:$0xff]  ;;  %v1138_v25 = vmul.f32 %v3252_v3, %v1032_v55  ;;  %v1044_v55 = vmul.f32 0.6931472, %v3237_v28  ;;  %v1048_v28 = vmul.f32 0.6931472, %v3243_v58 }
 0x1c6   :  { %v3373_v42 = vpop.eup %2154  ;;  %2174 = vlog2.f32 %v4158_v12 }
 0x1c7   :  { %v3380_v30 = vpop.eup %2156  ;;  %2176 = vlog2.f32 %v4159_v24  ;;  %v3400_v24 = vmul.f32 1.442695, %v1133_v33  ;;  %v1144_v58 = vmul.f32 %v3252_v3, %v1044_v55  ;;  %v1058_v55 = vmul.f32 0.6931472, %v3268_v18 }
 0x1c8   :  { %v3386_v46 = vpop.eup %2158  ;;  %2178 = vlog2.f32 %v4160_v17  ;;  %v1038_v17 = vmul.f32 0.6931472, %v3228_v19  ;;  %v1040_v19 = vmul.f32 0.6931472, %v3231_v56 }
 0x1c9   :  { %v3394_v12 = vpop.eup %2160  ;;  %2180 = vpow2.f32 %v3287_v0  ;;  %v1139_v0 = vmul.f32 %v3252_v3, %v1034_v27  ;;  %v1046_v27 = vmul.f32 0.6931472, %v3240_v1  ;;  %v3440_v1 = vmul.f32 1.442695, %v1138_v25 }
 0x1ca   :  { %v3402_v63 = vpop.eup %2162  ;;  %2182 = vpow2.f32 %v3294_v6  ;;  %v1141_v56 = vmul.f32 %v3252_v3, %v1038_v17  ;;  %v1050_v17 = vmul.f32 0.6931472, %v3246_v7  ;;  %v1052_v7 = vmul.f32 0.6931472, %v3254_v37 }
 0x1cb   :  { %v3408_v41 = vpop.eup %2164  ;;  %2184 = vpow2.f32 %v3306_v15  ;;  %v1140_v15 = vmul.f32 %v3252_v3, %v1036_v50  ;;  %v3442_v50 = vmul.f32 1.442695, %v1139_v0 }
 0x1cc   :  { %v3415_v33 = vpop.eup %2166  ;;  %2186 = vpow2.f32 %v3308_v51  ;;  %v3434_v51 = vmul.f32 1.442695, %v1137_v59  ;;  %v3462_v4 = vmul.f32 1.442695, %v1141_v56  ;;  %v1060_v56 = vmul.f32 0.6931472, %v3272_v32 }
 0x1cd   :  { %v3422_v6 = vpop.eup %2168  ;;  %2188 = vpow2.f32 %v3314_v21  ;;  %v3455_v25 = vmul.f32 1.442695, %v1140_v15  ;;  %v1147_v15 = vmul.f32 %v3252_v3, %v1050_v17 }
 0x1ce   :  { %v3428_v26 = vpop.eup %2170  ;;  %2190 = vpow2.f32 %v3316_v61  ;;  %v1142_v61 = vmul.f32 %v3252_v3, %v1040_v19  ;;  %v1054_v19 = vmul.f32 0.6931472, %v3257_v47  ;;  %v3472_v47 = vmul.f32 1.442695, %v1143_v31 }
 0x1cf   :  { %v3436_v48 = vpop.eup %2172  ;;  %2192 = vpow2.f32 %v3329_v10  ;;  %v1145_v10 = vmul.f32 %v3252_v3, %v1046_v27  ;;  %v1146_v27 = vmul.f32 %v3252_v3, %v1048_v28  ;;  %v1062_v28 = vmul.f32 0.6931472, %v3276_v14 }
 0x1d0   :  { %v3444_v21 = vpop.eup %2174  ;;  %2194 = vpow2.f32 %v3336_v45  ;;  %v3470_v37 = vmul.f32 1.442695, %v1142_v61  ;;  %v1149_v17 = vmul.f32 %v3252_v3, %v1054_v19  ;;  %v1064_v14 = vmul.f32 0.6931472, %v3282_v44 }
 0x1d1   :  { %v3450_v59 = vpop.eup %2176  ;;  %2196 = vpow2.f32 %v3348_v38  ;;  %v3480_v18 = vmul.f32 1.442695, %v1145_v10  ;;  %v3493_v31 = vmul.f32 1.442695, %v1146_v27  ;;  %v1066_v10 = vmul.f32 0.6931472, %v3289_v60 }
 0x1d2   :  { %4161 = vst [vmem:[#allocation100_spill] sm:$0xff] %v3450_v59  ;;  %v3457_v0 = vpop.eup %2178  ;;  %2198 = vpow2.f32 %v3350_v53  ;;  %v1056_v59 = vmul.f32 0.6931472, %v3262_v43  ;;  %v3478_v43 = vmul.f32 1.442695, %v1144_v58  ;;  %v1153_v44 = vmul.f32 %v3252_v3, %v1062_v28 }
 0x1d3   :  { %v2181_v45 = vpop.eup %2180  ;;  %2200 = vpow2.f32 %v3356_v49  ;;  %v1070_v19 = vmul.f32 0.6931472, %v3302_v40  ;;  %v1154_v28 = vmul.f32 %v3252_v3, %v1064_v14 }
 0x1d4   :  { %v2183_v38 = vpop.eup %2182  ;;  %2202 = vpow2.f32 %v3358_v29  ;;  %v1148_v29 = vmul.f32 %v3252_v3, %v1052_v7  ;;  %v1150_v32 = vmul.f32 %v3252_v3, %v1056_v59  ;;  %v3500_v7 = vmul.f32 1.442695, %v1147_v15 }
 0x1d5   :  { %v3474_v53 = vpop.eup %2184  ;;  %2204 = vpow2.f32 %v3371_v54  ;;  %v1151_v54 = vmul.f32 %v3252_v3, %v1058_v55  ;;  %v1068_v59 = vmul.f32 0.6931472, %v3296_v22  ;;  %v1072_v15 = vmul.f32 0.6931472, %v3310_v9 }
 0x1d6   :  { %v3482_v49 = vpop.eup %2186  ;;  %2206 = vpow2.f32 %v3378_v2  ;;  %v3512_v60 = vmul.f32 1.442695, %v1148_v29  ;;  %v3518_v22 = vmul.f32 1.442695, %v1150_v32  ;;  %v1157_v9 = vmul.f32 %v3252_v3, %v1070_v19 }
 0x1d7   :  { %v3488_v61 = vpop.eup %2188  ;;  %2208 = vpow2.f32 %v3390_v13  ;;  %v1152_v13 = vmul.f32 %v3252_v3, %v1060_v56  ;;  %v3520_v40 = vmul.f32 1.442695, %v1151_v54  ;;  %v1074_v56 = vmul.f32 0.6931472, %v3318_v23 }
 0x1d8   :  { %v3495_v58 = vpop.eup %2190  ;;  %2210 = vpow2.f32 %v3392_v34  ;;  %v3514_v34 = vmul.f32 1.442695, %v1149_v17  ;;  %v1156_v17 = vmul.f32 %v3252_v3, %v1068_v59  ;;  %v1076_v54 = vmul.f32 0.6931472, %v3324_v11 }
 0x1d9   :  { %v3502_v2 = vpop.eup %2192  ;;  %2212 = vpow2.f32 %v3398_v57  ;;  %v3533_v23 = vmul.f32 1.442695, %v1153_v44  ;;  %v1308_v14 = vadd.f32 %v2183_v38, %v2181_v45  ;;  %v1158_v59 = vmul.f32 %v3252_v3, %v1072_v15 }
 0x1da   :  { %v3508_v55 = vpop.eup %2194  ;;  %2214 = vpow2.f32 %v3400_v24  ;;  %v1155_v24 = vmul.f32 %v3252_v3, %v1066_v10  ;;  %v3544_v11 = vmul.f32 1.442695, %v1154_v28  ;;  %v1080_v38 = vmul.f32 0.6931472, %v3338_v20 }
 0x1db   :  { %v2197_v27 = vpop.eup %2196  ;;  %2216 = vpow2.f32 %v3413_v16  ;;  %v3529_v16 = vmul.f32 1.442695, %v1152_v13  ;;  %v1159_v13 = vmul.f32 %v3252_v3, %v1074_v56  ;;  %v1309_v15 = vadd.f32 %v3474_v53, %v1308_v14 }
 0x1dc   :  { %v2199_v57 = vpop.eup %2198  ;;  %2218 = vpow2.f32 %v3420_v39  ;;  %v1078_v39 = vmul.f32 0.6931472, %v3331_v52  ;;  %v3552_v52 = vmul.f32 1.442695, %v1156_v17  ;;  %v3564_v20 = vmul.f32 1.442695, %v1158_v59 }
 0x1dd   :  { %v2201_v29 = vpop.eup %2200  ;;  %2220 = vpow2.f32 %v3432_v8  ;;  %v1321_v19 = vadd.f32 %v2199_v57, %v2197_v27  ;;  %v1082_v27 = vmul.f32 0.6931472, %v3344_v36  ;;  %v1086_v17 = vmul.f32 0.6931472, %v3360_v35 }
 0x1de   :  { %v2203_v32 = vpop.eup %2202  ;;  %2222 = vpow2.f32 %v3434_v51  ;;  %v3546_v51 = vmul.f32 1.442695, %v1155_v24  ;;  %v1161_v56 = vmul.f32 %v3252_v3, %v1078_v39  ;;  %v1084_v24 = vmul.f32 0.6931472, %v3352_v5 }
 0x1df   :  { %v3535_v10 = vpop.eup %2204  ;;  %2224 = vpow2.f32 %v3440_v1  ;;  %v3554_v1 = vmul.f32 1.442695, %v1157_v9  ;;  %v3569_v36 = vmul.f32 1.442695, %v1159_v13  ;;  %v1088_v53 = vmul.f32 0.6931472, %v3366_v62 }
 0x1e0   :  { %v3540_v8 = vpop.eup %2206  ;;  %2226 = vpow2.f32 %v3442_v50  ;;  %v1160_v50 = vmul.f32 %v3252_v3, %v1076_v54  ;;  %v1162_v9 = vmul.f32 %v3252_v3, %v1080_v38  ;;  %v1310_v35 = vadd.f32 %v3482_v49, %v1309_v15 }
 0x1e1   :  { %v3548_v45 = vpop.eup %2208  ;;  %2228 = vpow2.f32 %v3455_v25  ;;  %v1322_v25 = vadd.f32 %v2201_v29, %v1321_v19  ;;  %v1163_v29 = vmul.f32 %v3252_v3, %v1082_v27  ;;  %v1090_v14 = vmul.f32 0.6931472, %v3373_v42 }
 0x1e2   :  { %v3556_v44 = vpop.eup %2210  ;;  %2230 = vpow2.f32 %v3462_v4  ;;  %v3576_v5 = vmul.f32 1.442695, %v1160_v50  ;;  %v1165_v19 = vmul.f32 %v3252_v3, %v1086_v17  ;;  %v3584_v13 = vmul.f32 1.442695, %v1161_v56 }
 0x1e3   :  { %v2213_v57 = vpop.eup %2212  ;;  %2232 = vpow2.f32 %v3470_v37  ;;  %v1323_v62 = vadd.f32 %v2203_v32, %v1322_v25  ;;  %v1092_v49 = vmul.f32 0.6931472, %v3380_v30  ;;  %v1166_v38 = vmul.f32 %v3252_v3, %v1088_v53 }
 0x1e4   :  { %v2215_v28 = vpop.eup %2214  ;;  %2234 = vpow2.f32 %v3472_v47  ;;  %v3591_v42 = vmul.f32 1.442695, %v1162_v9  ;;  %v3596_v32 = vmul.f32 1.442695, %v1163_v29  ;;  %v1094_v15 = vmul.f32 0.6931472, %v3386_v46 }
 0x1e5   :  { %v2217_v4 = vpop.eup %2216  ;;  %2236 = vpow2.f32 %v3478_v43  ;;  %v1334_v37 = vadd.f32 %v2215_v28, %v2213_v57  ;;  %v1164_v43 = vmul.f32 %v3252_v3, %v1084_v24  ;;  %v1167_v30 = vmul.f32 %v3252_v3, %v1090_v14 }
 0x1e6   :  { %v2219_v54 = vpop.eup %2218  ;;  %2238 = vpow2.f32 %v3480_v18  ;;  %v1096_v56 = vmul.f32 0.6931472, %v3394_v12  ;;  %v3607_v25 = vmul.f32 1.442695, %v1165_v19  ;;  %v1098_v28 = vmul.f32 0.6931472, %v3402_v63 }
 0x1e7   :  { %v2221_v47 = vpop.eup %2220  ;;  %2240 = vpow2.f32 %v3493_v31  ;;  %v1335_v39 = vadd.f32 %v2217_v4, %v1334_v37  ;;  %v1168_v46 = vmul.f32 %v3252_v3, %v1092_v49  ;;  %v3612_v24 = vmul.f32 1.442695, %v1166_v38 }
 0x1e8   :  { %v2223_v59 = vpop.eup %2222  ;;  %2242 = vpow2.f32 %v3500_v7  ;;  %v1311_v7 = vadd.f32 %v3488_v61, %v1310_v35  ;;  %v1169_v4 = vmul.f32 %v3252_v3, %v1094_v15  ;;  %v3618_v53 = vmul.f32 1.442695, %v1167_v30 }
 0x1e9   :  { %v3586_v18 = vpop.eup %2224  ;;  %2244 = vpow2.f32 %v3512_v60  ;;  %v1336_v27 = vadd.f32 %v2219_v54, %v1335_v39  ;;  %v1324_v60 = vadd.f32 %v3535_v10, %v1323_v62  ;;  %v1170_v37 = vmul.f32 %v3252_v3, %v1096_v56 }
 0x1ea   :  { %v3593_v31 = vpop.eup %2226  ;;  %2246 = vpow2.f32 %v3514_v34  ;;  %v3605_v34 = vmul.f32 1.442695, %v1164_v43  ;;  %v1312_v12 = vadd.f32 %v3495_v58, %v1311_v7  ;;  %v1102_v54 = vmul.f32 0.6931472, %v3415_v33 }
 0x1eb   :  { %v2229_v50 = vpop.eup %2228  ;;  %2248 = vpow2.f32 %v3518_v22  ;;  %v1337_v10 = vadd.f32 %v2221_v47, %v1336_v27  ;;  %v1325_v63 = vadd.f32 %v3540_v8, %v1324_v60  ;;  %v1171_v29 = vmul.f32 %v3252_v3, %v1098_v28 }
 0x1ec   :  { %v2231_v57 = vpop.eup %2230  ;;  %2250 = vpow2.f32 %v3520_v40  ;;  %v1313_v8 = vadd.f32 %v3502_v2, %v1312_v12  ;;  %v1104_v62 = vmul.f32 0.6931472, %v3422_v6  ;;  %v1106_v2 = vmul.f32 0.6931472, %v3428_v26 }
 0x1ed   :  { %v2233_v61 = vpop.eup %2232  ;;  %2252 = vpow2.f32 %v3529_v16  ;;  %v1347_v40 = vadd.f32 %v2231_v57, %v2229_v50  ;;  %v1100_v16 = vmul.f32 0.6931472, %v3408_v41  ;;  %v1338_v47 = vadd.f32 %v2223_v59, %v1337_v10 }
 0x1ee   :  { %v2235_v22 = vpop.eup %2234  ;;  %2254 = vpow2.f32 %v3533_v23  ;;  %v1326_v33 = vadd.f32 %v3548_v45, %v1325_v63  ;;  %v1173_v59 = vmul.f32 %v3252_v3, %v1102_v54  ;;  %v1314_v45 = vadd.f32 %v3508_v55, %v1313_v8 }
 0x1ef   :  { %v2237_v17 = vpop.eup %2236  ;;  %2256 = vpow2.f32 %v3544_v11  ;;  %v1348_v23 = vadd.f32 %v2233_v61, %v1347_v40  ;;  %v1284_v11 = vmul.f32 1.442695, %v1168_v46  ;;  %v1172_v43 = vmul.f32 %v3252_v3, %v1100_v16 }
 0x1f0   :  { %v2239_v9 = vpop.eup %2238  ;;  %2258 = vpow2.f32 %v3546_v51  ;;  %v1286_v51 = vmul.f32 1.442695, %v1169_v4  ;;  %v1327_v27 = vadd.f32 %v3556_v44, %v1326_v33  ;;  %v1108_v15 = vmul.f32 0.6931472, %v3436_v48 }
 0x1f1   :  { %v2241_v58 = vpop.eup %2240  ;;  %2260 = vpow2.f32 %v3552_v52  ;;  %v1349_v41 = vadd.f32 %v2235_v22, %v1348_v23  ;;  %v1288_v52 = vmul.f32 1.442695, %v1170_v37  ;;  %v1110_v55 = vmul.f32 0.6931472, %v3444_v21  ;;  %v4162_v21 = vld [vmem:[#allocation100_spill] sm:$0xff] }
 0x1f2   :  { %v2243_v35 = vpop.eup %2242  ;;  %2262 = vpow2.f32 %v3554_v1  ;;  %v1175_v57 = vmul.f32 %v3252_v3, %v1106_v2  ;;  %v1315_v44 = vrot.slane %v1314_v45, 4  ;;  %v1328_v61 = vrot.slane %v1327_v27, 4 }
 0x1f3   :  { %v2245_v14 = vpop.eup %2244  ;;  %2264 = vpow2.f32 %v3564_v20  ;;  %v1350_v19 = vadd.f32 %v2237_v17, %v1349_v41  ;;  %v1339_v20 = vadd.f32 %v3586_v18, %v1338_v47  ;;  %v1112_v22 = vmul.f32 0.6931472, %v4162_v21 }
 0x1f4   :  { %v2247_v39 = vpop.eup %2246  ;;  %2266 = vpow2.f32 %v3569_v36  ;;  %v1290_v36 = vmul.f32 1.442695, %v1171_v29  ;;  %v1114_v4 = vmul.f32 0.6931472, %v3457_v0  ;;  %v1329_v16 = vadd.f32 %v1328_v61, %v1327_v27 }
 0x1f5   :  { %v2249_v1 = vpop.eup %2248  ;;  %2268 = vpow2.f32 %v3576_v5  ;;  %v1360_v6 = vadd.f32 %v2247_v39, %v2245_v14  ;;  %v1351_v38 = vadd.f32 %v2239_v9, %v1350_v19  ;;  %v1174_v5 = vmul.f32 %v3252_v3, %v1104_v62 }
 0x1f6   :  { %v2251_v49 = vpop.eup %2250  ;;  %2270 = vpow2.f32 %v3584_v13  ;;  %v1292_v13 = vmul.f32 1.442695, %v1172_v43  ;;  %v1340_v48 = vadd.f32 %v3593_v31, %v1339_v20  ;;  %v1178_v54 = vmul.f32 %v3252_v3, %v1112_v22 }
 0x1f7   :  { %v2253_v7 = vpop.eup %2252  ;;  %2272 = vpow2.f32 %v3591_v42  ;;  %v1361_v26 = vadd.f32 %v2249_v1, %v1360_v6  ;;  %v1352_v18 = vadd.f32 %v2241_v58, %v1351_v38  ;;  %v1296_v12 = vmul.f32 1.442695, %v1174_v5 }
 0x1f8   :  { %v2255_v50 = vpop.eup %2254  ;;  %2274 = vpow2.f32 %v3596_v32  ;;  %v1294_v32 = vmul.f32 1.442695, %v1173_v59  ;;  %v1341_v63 = vrot.slane %v1340_v48, 4  ;;  %v1298_v29 = vmul.f32 1.442695, %v1175_v57 }
 0x1f9   :  { %v2257_v30 = vpop.eup %2256  ;;  %2276 = vpow2.f32 %v3605_v34  ;;  %v1362_v60 = vadd.f32 %v2251_v49, %v1361_v26  ;;  %v1176_v34 = vmul.f32 %v3252_v3, %v1108_v15  ;;  %v1330_v33 = vrot.slane %v1329_v16, 2 }
 0x1fa   :  { %v2259_v42 = vpop.eup %2258  ;;  %2278 = vpow2.f32 %v3607_v25  ;;  %v1353_v25 = vadd.f32 %v2243_v35, %v1352_v18  ;;  %v1342_v62 = vadd.f32 %v1341_v63, %v1340_v48  ;;  %v1304_v20 = vmul.f32 1.442695, %v1178_v54 }
 0x1fb   :  { %v2261_v56 = vpop.eup %2260  ;;  %2280 = vpow2.f32 %v3612_v24  ;;  %v1363_v28 = vadd.f32 %v2253_v7, %v1362_v60  ;;  %v1316_v24 = vadd.f32 %v1315_v44, %v1314_v45  ;;  %v1300_v41 = vmul.f32 1.442695, %v1176_v34 }
 0x1fc   :  { %v2263_v46 = vpop.eup %2262  ;;  %2282 = vpow2.f32 %v3618_v53  ;;  %v1177_v53 = vmul.f32 %v3252_v3, %v1110_v55  ;;  %v1354_v35 = vrot.slane %v1353_v25, 4  ;;  %v1343_v7 = vrot.slane %v1342_v62, 2 }
 0x1fd   :  { %v2265_v10 = vpop.eup %2264  ;;  %2284 = vpow2.f32 %v1284_v11  ;;  %v1364_v40 = vadd.f32 %v2255_v50, %v1363_v28  ;;  %v1373_v17 = vadd.f32 %v2263_v46, %v2261_v56  ;;  %v1317_v14 = vrot.slane %v1316_v24, 2 }
 0x1fe   :  { %v2267_v31 = vpop.eup %2266  ;;  %2286 = vpow2.f32 %v1286_v51  ;;  %v1302_v19 = vmul.f32 1.442695, %v1177_v53  ;;  %v1355_v59 = vadd.f32 %v1354_v35, %v1353_v25  ;;  %v1331_v27 = vadd.f32 %v1330_v33, %v1329_v16 }
 0x1ff   :  { %v2269_v9 = vpop.eup %2268  ;;  %2288 = vpow2.f32 %v1288_v52  ;;  %v1365_v37 = vadd.f32 %v2257_v30, %v1364_v40  ;;  %v1374_v23 = vadd.f32 %v2265_v10, %v1373_v17  ;;  %v1179_v52 = vmul.f32 %v3252_v3, %v1114_v4 }
 0x200   :  { %v2271_v58 = vpop.eup %2270  ;;  %2290 = vpow2.f32 %v1290_v36  ;;  %v1318_v38 = vadd.f32 %v1317_v14, %v1316_v24  ;;  %v1356_v30 = vrot.slane %v1355_v59, 2  ;;  %v1344_v57 = vadd.f32 %v1343_v7, %v1342_v62 }
 0x201   :  { %v2273_v11 = vpop.eup %2272  ;;  %2292 = vpow2.f32 %v1292_v13  ;;  %v1366_v8 = vadd.f32 %v2259_v42, %v1365_v37  ;;  %v1375_v0 = vadd.f32 %v2267_v31, %v1374_v23  ;;  %v1306_v5 = vmul.f32 1.442695, %v1179_v52 }
 0x202   :  { %v2275_v47 = vpop.eup %2274  ;;  %2294 = vpow2.f32 %v1294_v32  ;;  %v1319_v42 = vrot.slane %v1318_v38, 1  ;;  %v1332_v48 = vrot.slane %v1331_v27, 1  ;;  %v1357_v21 = vadd.f32 %v1356_v30, %v1355_v59 }
 0x203   :  { %v2277_v51 = vpop.eup %2276  ;;  %2296 = vpow2.f32 %v1296_v12  ;;  %v1376_v39 = vadd.f32 %v2269_v9, %v1375_v0  ;;  %v1367_v1 = vrot.slane %v1366_v8, 4  ;;  %v1345_v40 = vrot.slane %v1344_v57, 1 }
 0x204   :  { %v2279_v43 = vpop.eup %2278  ;;  %2298 = vpow2.f32 %v1298_v29  ;;  %v1320_v25 = vadd.f32 %v1319_v42, %v1318_v38  ;;  %v1333_v17 = vadd.f32 %v1332_v48, %v1331_v27  ;;  %v1358_v16 = vrot.slane %v1357_v21, 1 }
 0x205   :  { %v2281_v2 = vpop.eup %2280  ;;  %v1377_v6 = vadd.f32 %v2271_v58, %v1376_v39  ;;  %v1386_v49 = vadd.f32 %v2279_v43, %v2277_v51  ;;  %2300 = vpow2.f32 %v1300_v41  ;;  %v1368_v3 = vadd.f32 %v1367_v1, %v1366_v8 }
 0x206   :  { %v2283_v45 = vpop.eup %2282  ;;  %2302 = vpow2.f32 %v1302_v19  ;;  %v1346_v53 = vadd.f32 %v1345_v40, %v1344_v57  ;;  %v1413_v54 = vmul.f32 0.015625, %v1320_v25  ;;  %v1414_v8 = vmul.f32 0.015625, %v1333_v17 }
 0x207   :  { %v2285_v36 = vpop.eup %2284  ;;  %v1378_v26 = vadd.f32 %v2273_v11, %v1377_v6  ;;  %v1387_v50 = vadd.f32 %v2281_v2, %v1386_v49  ;;  %2304 = vpow2.f32 %v1304_v20  ;;  %v1369_v28 = vrot.slane %v1368_v3, 2 }
 0x208   :  { %v2287_v15 = vpop.eup %2286  ;;  %2306 = vpow2.f32 %v1306_v5  ;;  %v1359_v41 = vadd.f32 %v1358_v16, %v1357_v21  ;;  %v1415_v33 = vmul.f32 0.015625, %v1346_v53  ;;  %v1430_v19 = vsel %vm1429_vm9, %v1414_v8, %v1413_v54 }
 0x209   :  { %v2289_v13 = vpop.eup %2288  ;;  %v1379_v55 = vadd.f32 %v2275_v47, %v1378_v26  ;;  %v1388_v18 = vadd.f32 %v2283_v45, %v1387_v50  ;;  %v1370_v9 = vadd.f32 %v1369_v28, %v1368_v3 }
 0x20a   :  { %v2291_v60 = vpop.eup %2290  ;;  %v1416_v6 = vmul.f32 0.015625, %v1359_v41  ;;  %v1432_v49 = vsel %vm1431_vm10, %v1415_v33, %v1430_v19 }
 0x20b   :  { %v2293_v44 = vpop.eup %2292  ;;  %v1380_v56 = vrot.slane %v1379_v55, 4  ;;  %v1389_v32 = vadd.f32 %v2285_v36, %v1388_v18  ;;  %v1371_v47 = vrot.slane %v1370_v9, 1 }
 0x20c   :  { %v2295_v61 = vpop.eup %2294  ;;  %v1434_v27 = vsel %vm1433_vm11, %v1416_v6, %v1432_v49 }
 0x20d   :  { %v2297_v46 = vpop.eup %2296  ;;  %v1381_v22 = vadd.f32 %v1380_v56, %v1379_v55  ;;  %v1390_v34 = vadd.f32 %v2287_v15, %v1389_v32  ;;  %v1399_v12 = vadd.f32 %v2295_v61, %v2293_v44  ;;  %v1372_v1 = vadd.f32 %v1371_v47, %v1370_v9 }
 0x20e   :  { %v2299_v10 = vpop.eup %2298 }
 0x20f   :  { %v1382_v31 = vrot.slane %v1381_v22, 2  ;;  %v1391_v4 = vadd.f32 %v2289_v13, %v1390_v34  ;;  %v1400_v24 = vadd.f32 %v2297_v46, %v1399_v12  ;;  %v2301_v63 = vpop.eup %2300  ;;  %v1417_v7 = vmul.f32 0.015625, %v1372_v1 }
 0x210   :  { %v2303_v58 = vpop.eup %2302 }
 0x211   :  { %v1392_v37 = vadd.f32 %v2291_v60, %v1391_v4  ;;  %v1401_v23 = vadd.f32 %v2299_v10, %v1400_v24  ;;  %v1383_v29 = vadd.f32 %v1382_v31, %v1381_v22  ;;  %v2305_v0 = vpop.eup %2304  ;;  %v1436_v5 = vsel %vm1435_vm12, %v1417_v7, %v1434_v27 }
 0x212   :  { %v2307_v51 = vpop.eup %2306 }
 0x213   :  { %v1393_v11 = vrot.slane %v1392_v37, 4  ;;  %v1402_v35 = vadd.f32 %v2301_v63, %v1401_v23  ;;  %v1384_v39 = vrot.slane %v1383_v29, 1 }
 0x215   :  { %v1394_v14 = vadd.f32 %v1393_v11, %v1392_v37  ;;  %v1403_v62 = vadd.f32 %v2303_v58, %v1402_v35  ;;  %v1385_v45 = vadd.f32 %v1384_v39, %v1383_v29 }
 0x217   :  { %v1395_v43 = vrot.slane %v1394_v14, 2  ;;  %v1404_v52 = vadd.f32 %v2305_v0, %v1403_v62  ;;  %v1418_v15 = vmul.f32 0.015625, %v1385_v45 }
 0x219   :  { %v1396_v2 = vadd.f32 %v1395_v43, %v1394_v14  ;;  %v1405_v59 = vadd.f32 %v2307_v51, %v1404_v52  ;;  %v1438_v55 = vsel %vm1437_vm13, %v1418_v15, %v1436_v5 }
 0x21b   :  { %v1397_v20 = vrot.slane %v1396_v2, 1  ;;  %v1406_v38 = vrot.slane %v1405_v59, 4 }
 0x21d   :  { %v1407_v36 = vadd.f32 %v1406_v38, %v1405_v59  ;;  %v1398_v26 = vadd.f32 %v1397_v20, %v1396_v2 }
 0x21f   :  { %v1408_v50 = vrot.slane %v1407_v36, 2  ;;  %v1419_v13 = vmul.f32 0.015625, %v1398_v26 }
 0x221   :  { %v1409_v3 = vadd.f32 %v1408_v50, %v1407_v36  ;;  %v1440_v60 = vsel %vm1439_vm14, %v1419_v13, %v1438_v55 }
 0x223   :  { %v1410_v30 = vrot.slane %v1409_v3, 1 }
 0x225   :  { %v1411_v18 = vadd.f32 %v1410_v30, %v1409_v3 }
 0x227   :  { %v1420_v42 = vmul.f32 0.015625, %v1411_v18 }
 0x229   :  { %v1442_v57 = vsel %vm1441_vm15, %v1420_v42, %v1440_v60 }
 0x22a   :  { %1444 = vst [vmem:[#allocation2] sm:$0xff] %v1442_v57 }
 0x22b PF:  { %v1448_v44 = vstv %s3833_s0  ;;  %v2309_v48 = vld [vmem:[%s3837_s4] sm:$0xff]   ;;  %v2355_v56 = vmov 0.0   ;;  %v2310_v32 = vld [vmem:[%s3837_s4 + $0x8] sm:$0xff]   ;;  %vm2356_vm0 = vmmov 0   ;;  %v2311_v61 = vld [vmem:[%s3837_s4 + $0x10] sm:$0xff]   ;;  %v1456_v34 = vlaneseq  ;;  %s1455_s19 = sld [smem:[#allocation4]] }
 0x22c   :  { %2317 = vrcp.f32 %v1448_v44  ;;  %1970 = vmatprep.subr.bf16.mxu1 %v2355_v56  ;;  %1986 = vmatprep.mubr.msk.bf16.mxu1 %vm2356_vm0, %v2355_v56  ;;  %v2312_v28 = vld [vmem:[%s3837_s4 + $0x18] sm:$0xff]   ;;  %v2313_v21 = vld [vmem:[%s3837_s4 + $0x20] sm:$0xff]   ;;  %v2314_v22 = vld [vmem:[%s3837_s4 + $0x28] sm:$0xff]  }
 0x22d   :  { %1971 = vmatpush3.bf16.msra.mxu1 %v2309_v48  ;;  %v2315_v12 = vld [vmem:[%s3837_s4 + $0x30] sm:$0xff]   ;;  %v1457_v10 = vshrl.u32 %v1456_v34, 7  ;;  %v2316_v25 = vld [vmem:[%s3837_s4 + $0x38] sm:$0xff]   ;;  %v3695_v40 = vand.u32 127, %v1456_v34  ;;  %v1617_v33 = vld [vmem:[%s3839_s6] sm:$0xff] }
 0x22e   :  { %1972 = vmatprep.subr.bf16.mxu1 %v2355_v56  ;;  %v1618_v39 = vld [vmem:[%s3839_s6 + $0x8] sm:$0xff]  ;;  %v1619_v43 = vld [vmem:[%s3839_s6 + $0x10] sm:$0xff]  ;;  %v1620_v52 = vld [vmem:[%s3839_s6 + $0x18] sm:$0xff]  ;;  %v1633_v19 = vmul.f32 %v1617_v33, %v1617_v33 }
 0x22f   :  { %v1460_v17 = vmul.u32 128, %v1457_v10  ;;  %v1634_v1 = vmul.f32 %v1618_v39, %v1618_v39  ;;  %v1635_v2 = vmul.f32 %v1619_v43, %v1619_v43  ;;  %v1621_v59 = vld [vmem:[%s3839_s6 + $0x20] sm:$0xff]  ;;  %v1636_v6 = vmul.f32 %v1620_v52, %v1620_v52  ;;  %v1622_v45 = vld [vmem:[%s3839_s6 + $0x28] sm:$0xff]  ;;  %v1623_v7 = vld [vmem:[%s3839_s6 + $0x30] sm:$0xff] }
 0x230   :  { %v1637_v20 = vmul.f32 %v1621_v59, %v1621_v59  ;;  %v1638_v36 = vmul.f32 %v1622_v45, %v1622_v45  ;;  %v1624_v26 = vld [vmem:[%s3839_s6 + $0x38] sm:$0xff]  ;;  %v1639_v50 = vmul.f32 %v1623_v7, %v1623_v7  ;;  %v3728_v5 = vld [vmem:[%s3839_s6 + $0x40] sm:$0xff]  ;;  %v3733_v30 = vld [vmem:[%s3839_s6 + $0x48] sm:$0xff] }
 0x231   :  { %1973 = vmatpush3.bf16.msra.mxu1 %v2310_v32  ;;  %v1461_v31 = vadd.s32 %v1460_v17, %v3695_v40  ;;  %v1462_v4 = vstv %s1455_s19  ;;  %v1445_v9 = vld [vmem:[#allocation2] sm:$0xff]  ;;  %v1649_v49 = vadd.f32 %v1634_v1, %v1633_v19  ;;  %v1640_v3 = vmul.f32 %v1624_v26, %v1624_v26  ;;  %v3740_v60 = vld [vmem:[%s3839_s6 + $0x50] sm:$0xff]  ;;  %v3747_v44 = vld [vmem:[%s3839_s6 + $0x58] sm:$0xff] }
 0x232   :  { %1974 = vmatprep.subr.bf16.mxu1 %v2355_v56  ;;  %2319 = vlog2.f32 %v1445_v9  ;;  %v1641_v55 = vmul.f32 %v3728_v5, %v3728_v5  ;;  %v1642_v42 = vmul.f32 %v3733_v30, %v3733_v30  ;;  %v1643_v48 = vmul.f32 %v3740_v60, %v3740_v60  ;;  %v3775_v17 = vld [vmem:[%s3839_s6 + $0x78] sm:$0xff] }
 0x233   :  { %v1463_v24 = vadd.s32 %v1462_v4, %v1461_v31  ;;  %v1650_v38 = vadd.f32 %v1649_v49, %v1635_v2 }
 0x235   :  { %1975 = vmatpush3.bf16.msra.mxu1 %v2311_v61  ;;  %v1464_v63 = vmul.u32 2654435761, %v1463_v24  ;;  %v1651_v27 = vadd.f32 %v1650_v38, %v1636_v6  ;;  %v3754_v61 = vld [vmem:[%s3839_s6 + $0x60] sm:$0xff]  ;;  %v1648_v24 = vmul.f32 %v3775_v17, %v3775_v17 }
 0x236   :  { %v2318_v46 = vpop.eup %2317  ;;  %1976 = vmatprep.subr.bf16.mxu1 %v2355_v56 }
 0x237   :  { %2014 = vpush %v2318_v46  ;;  %v1465_v16 = vshrl.u32 %v1464_v63, 16  ;;  %v1652_v15 = vadd.f32 %v1651_v27, %v1637_v20 }
 0x239   :  { %1977 = vmatpush3.bf16.msra.mxu1 %v2312_v28  ;;  %v1466_v37 = vxor.u32 %v1465_v16, %v1464_v63  ;;  %v1653_v13 = vadd.f32 %v1652_v15, %v1638_v36  ;;  %v1644_v28 = vmul.f32 %v3747_v44, %v3747_v44 }
 0x23a   :  { %1978 = vmatprep.subr.bf16.mxu1 %v2355_v56 }
 0x23b   :  { %v1467_v23 = vmul.u32 2146121005, %v1466_v37  ;;  %v1654_v18 = vadd.f32 %v1653_v13, %v1639_v50 }
 0x23c   :  { %v2320_v58 = vpop.eup %2319 }
 0x23d   :  { %1979 = vmatpush3.bf16.msra.mxu1 %v2313_v21  ;;  %v1468_v53 = vshrl.u32 %v1467_v23, 15  ;;  %v1447_v54 = vmul.f32 0.6931472, %v2320_v58  ;;  %v1655_v57 = vadd.f32 %v1654_v18, %v1640_v3  ;;  %v3761_v21 = vld [vmem:[%s3839_s6 + $0x68] sm:$0xff] }
 0x23e   :  { %1980 = vmatprep.subr.bf16.mxu1 %v2355_v56  ;;  %v1646_v10 = vmul.f32 %v3761_v21, %v3761_v21 }
 0x23f   :  { %v1469_v29 = vxor.u32 %v1468_v53, %v1467_v23  ;;  %v1656_v32 = vadd.f32 %v1655_v57, %v1641_v55 }
 0x241   :  { %1981 = vmatpush3.bf16.msra.mxu1 %v2314_v22  ;;  %v1470_v8 = vmul.u32 2221713035, %v1469_v29  ;;  %v1657_v46 = vadd.f32 %v1656_v32, %v1642_v42  ;;  %v1645_v22 = vmul.f32 %v3754_v61, %v3754_v61 }
 0x242   :  { %1982 = vmatprep.subr.bf16.mxu1 %v2355_v56 }
 0x243   :  { %v1471_v47 = vshrl.u32 %v1470_v8, 16  ;;  %v1658_v34 = vadd.f32 %v1657_v46, %v1643_v48 }
 0x245   :  { %1983 = vmatpush3.bf16.msra.mxu1 %v2315_v12  ;;  %v1472_v41 = vxor.u32 %v1471_v47, %v1470_v8  ;;  %v3768_v12 = vld [vmem:[%s3839_s6 + $0x70] sm:$0xff] }
 0x246   :  { %1984 = vmatprep.subr.bf16.mxu1 %v2355_v56  ;;  %v1647_v31 = vmul.f32 %v3768_v12, %v3768_v12 }
 0x247   :  { %vm1473_vm1 = vcmp.ge.u32.totalorder %v1472_v41, 429496729 }
 0x248   :  { %vm1849_vm2 = vmpackc.low %vm1473_vm1, %vm1473_vm1 }
 0x249   :  { %1985 = vmatpush3.bf16.msra.mxu1 %v2316_v25  ;;  %v1659_v25 = vadd.f32 %v1658_v34, %v1644_v28 }
 0x24a   :  { %1990 = vmatprep.subr.bf16.mxu1 %v2355_v56 }
 0x24b   :  { %v1660_v4 = vadd.f32 %v1659_v25, %v1645_v22 }
 0x24d   :  { %v1661_v63 = vadd.f32 %v1660_v4, %v1646_v10 }
 0x24f   :  { %v1662_v9 = vadd.f32 %v1661_v63, %v1647_v31 }
 0x251   :  { %v1663_v16 = vadd.f32 %v1662_v9, %v1648_v24 }
 0x253   :  { %v1664_v37 = vrot.slane %v1663_v16, 4 }
 0x255   :  { %v1665_v23 = vadd.f32 %v1664_v37, %v1663_v16 }
 0x257   :  { %v1666_v58 = vrot.slane %v1665_v23, 2 }
 0x259   :  { %v1667_v53 = vadd.f32 %v1666_v58, %v1665_v23 }
 0x268   :  { %s2015_s4 = spop %2014 }
 0x269   :  { %v1451_v11 = vstv %s2015_s4 }
 0x26a   :  { %v1452_v35 = vmul.f32 %v1451_v11, %v1447_v54  ;;  %v1668_v54 = vrot.slane %v1667_v53, 1 }
 0x26c   :  { %v1453_v0 = vmul.f32 1.442695, %v1452_v35  ;;  %v1669_v29 = vadd.f32 %v1668_v54, %v1667_v53 }
 0x26e   :  { %2321 = vpow2.f32 %v1453_v0  ;;  %v1670_v11 = vadd.f32 1e-24, %v1669_v29 }
 0x270   :  { %2323 = vrsqrt.f32 %v1670_v11 }
 0x278   :  { %v2322_v14 = vpop.eup %2321 }
 0x279   :  { %v1474_v62 = vmul.f32 1.1111112, %v2322_v14 }
 0x27a   :  { %v3781_v35 = vpop.eup %2323 }
 0x27b   :  { %v1850_v51 = vpack.c.bf16 %v1474_v62, %v1474_v62  ;;  %v1672_v8 = vmul.f32 %v3781_v35, %v1617_v33  ;;  %v1673_v0 = vmul.f32 %v3781_v35, %v1618_v39  ;;  %v1674_v47 = vmul.f32 %v3781_v35, %v1619_v43  ;;  %v1840_v43 = vld [vmem:[%s3838_s5] ss:$0 sm:$0xff] }
 0x27c   :  { %v1675_v41 = vmul.f32 %v3781_v35, %v1620_v52  ;;  %v1677_v19 = vmul.f32 %v3781_v35, %v1622_v45  ;;  %v1678_v2 = vmul.f32 %v3781_v35, %v1623_v7  ;;  %v1679_v33 = vmul.f32 %v3781_v35, %v1624_v26 }
 0x27d   :  { %1987 = vmatmul.mubr.msk.bf16.vlgmr.msra.gmra.mrb[20].mxu1 %vm1849_vm2, %v1850_v51  ;;  %v1689_v14 = vpack.c.bf16 %v1673_v0, %v1672_v8  ;;  %v1676_v51 = vmul.f32 %v3781_v35, %v1621_v59  ;;  %v1680_v4 = vmul.f32 %v3781_v35, %v3728_v5  ;;  %v1681_v24 = vmul.f32 %v3781_v35, %v3733_v30 }
 0x27e   :  { %2006 = vmatprep.mubr.msk.bf16.mxu1 %vm2356_vm0, %v2355_v56  ;;  %v1690_v62 = vpack.c.bf16 %v1675_v41, %v1674_v47  ;;  %v1692_v39 = vpack.c.bf16 %v1679_v33, %v1678_v2  ;;  %v1682_v9 = vmul.f32 %v3781_v35, %v3740_v60  ;;  %v1683_v16 = vmul.f32 %v3781_v35, %v3747_v44 }
 0x27f   :  { %1991 = vmatpush3.bf16.msra.mxu1 %v1689_v14  ;;  %v1691_v1 = vpack.c.bf16 %v1677_v19, %v1676_v51  ;;  %v1693_v63 = vpack.c.bf16 %v1681_v24, %v1680_v4  ;;  %v1684_v37 = vmul.f32 %v3781_v35, %v3754_v61  ;;  %v1685_v23 = vmul.f32 %v3781_v35, %v3761_v21  ;;  %v1753_v61 = vld [vmem:[%s3840_s7] sm:$0xff]  ;;  %s2358_s7 = smov [#allocation5]  }
 0x280   :  { %1992 = vmatprep.subr.bf16.mxu1 %v2355_v56  ;;  %v1694_v5 = vpack.c.bf16 %v1683_v16, %v1682_v9  ;;  %v1686_v30 = vmul.f32 %v3781_v35, %v3768_v12  ;;  %v1687_v60 = vmul.f32 %v3781_v35, %v3775_v17  ;;  %v2357_v21 = vmov 0   ;;  %s1767_s28 = sshll.u32 %s2358_s7, 4  ;;  %s1768_s28 = int_to_ptr.vmem [resolvable:$true] %s1767_s28 }
 0x281   :  { %v1695_v58 = vpack.c.bf16 %v1685_v23, %v1684_v37  ;;  %2308 = vset.pattern.permute.xlu0 %v2357_v21  ;;  %s2331_s29 = scalar_lea.vmem %s1768_s28, 128  ;;  %p2336_p2 = scmp.lt.s32.totalorder %s1768_s28, %s1768_s28 }
 0x282   :  { %v1696_v44 = vpack.c.bf16 %v1687_v60, %v1686_v30  ;;  %p2332_p1 = scmp.ne.s32.totalorder %s1768_s28, %s2331_s29  ;;  %p2337_p3 = scmp.lt.s32.totalorder %s2331_s29, %s2331_s29 }
 0x283   :  { %1993 = vmatpush3.bf16.msra.mxu1 %v1690_v62 }
 0x284   :  { %1994 = vmatprep.subr.bf16.mxu1 %v2355_v56  ;;  %p2338_p4 = por %p2337_p3, %p2336_p2 }
 0x286   :  { %p2339_p5 = pnand %p2338_p4, %p2332_p1 }
 0x287   :  { %1995 = vmatpush3.bf16.msra.mxu1 %v1691_v1 }
 0x288   :  { %1996 = vmatprep.subr.bf16.mxu1 %v2355_v56 }
 0x28b   :  { %1997 = vmatpush3.bf16.msra.mxu1 %v1692_v39 }
 0x28c   :  { %1998 = vmatprep.subr.bf16.mxu1 %v2355_v56 }
 0x28f   :  { %1999 = vmatpush3.bf16.msra.mxu1 %v1693_v63 }
 0x290   :  { %2000 = vmatprep.subr.bf16.mxu1 %v2355_v56 }
 0x293   :  { %2001 = vmatpush3.bf16.msra.mxu1 %v1694_v5 }
 0x294   :  { %2002 = vmatprep.subr.bf16.mxu1 %v2355_v56 }
 0x297   :  { %2003 = vmatpush3.bf16.msra.mxu1 %v1695_v58 }
 0x298   :  { %2004 = vmatprep.subr.bf16.mxu1 %v2355_v56 }
 0x29b   :  { %2005 = vmatpush3.bf16.msra.mxu1 %v1696_v44 }
 0x350   :  { %v1582_v52 = vpop.f32.mrb[20].mxu1 }
 0x351   :  { %v1583_v59 = vadd.f32 %v1840_v43, %v1582_v52  ;;  %v1988_v6 = vpop.f32.mrb[21].mxu1 }
 0x352   :  { %v1585_v49 = vpop.f32.mrb[22].mxu1 }
 0x353   :  { %v1588_v45 = vrot.slane %v1583_v59, 4  ;;  %v1596_v20 = vmul.f32 %v1583_v59, %v1583_v59  ;;  %v1989_v38 = vpop.f32.mrb[23].mxu1 }
 0x355   :  { %v1589_v7 = vadd.f32 %v1588_v45, %v1583_v59  ;;  %v1597_v36 = vrot.slane %v1596_v20, 4 }
 0x357   :  { %v1598_v27 = vadd.f32 %v1597_v36, %v1596_v20  ;;  %v1590_v26 = vrot.slane %v1589_v7, 2 }
 0x359   :  { %v1599_v50 = vrot.slane %v1598_v27, 2  ;;  %v1591_v15 = vadd.f32 %v1590_v26, %v1589_v7 }
 0x35b   :  { %v1600_v3 = vadd.f32 %v1599_v50, %v1598_v27  ;;  %v1592_v13 = vrot.slane %v1591_v15, 1 }
 0x35d   :  { %v1593_v55 = vadd.f32 %v1592_v13, %v1591_v15  ;;  %v1601_v18 = vrot.slane %v1600_v3, 1 }
 0x35f   :  { %v1595_v42 = vmul.f32 0.125, %v1593_v55  ;;  %v1602_v57 = vadd.f32 %v1601_v18, %v1600_v3 }
 0x361   :  { %v1603_v48 = vmul.f32 0.125, %v1602_v57  ;;  %v1604_v32 = vmul.f32 %v1595_v42, %v1595_v42  ;;  %v1607_v34 = vsub.f32 %v1583_v59, %v1595_v42 }
 0x363   :  { %v1605_v28 = vsub.f32 %v1603_v48, %v1604_v32 }
 0x365   :  { %v1606_v46 = vmax.f32 %v1605_v28, 0.0 }
 0x367   :  { %v1608_v22 = vadd.f32 1e-05, %v1606_v46 }
 0x369   :  { %2325 = vrsqrt.f32 %v1608_v22 }
 0x373   :  { %v2326_v10 = vpop.eup %2325 }
 0x374   :  { %v1610_v25 = vmul.f32 %v2326_v10, %v1607_v34 }
 0x376   :  { %v1611_v31 = vmul.f32 %v1610_v25, %v1610_v25 }
 0x378   :  { %1612 = vadd.xlane.f32.xlu0 %v1611_v31 }
 0x38e   :  { %1755 = vperm.xlu0 %2308, %v1753_v61  }
 0x405   :  { %v1613_v53 = vpop.xlane.xlu0 %1612 }
 0x406   :  { %v1614_v54 = vadd.f32 1e-24, %v1613_v53 }
 0x408   :  { %2327 = vrsqrt.f32 %v1614_v54 }
 0x40d   :  { %v1756_v1 = vpop.permute.xlu0 %1755 }
 0x40e   :  { %vm1757_vm5 = vcmp.eq.s32.totalorder %v3695_v40, %v1756_v1 }
 0x412   :  { %v2328_v12 = vpop.eup %2327 }
 0x413   :  { %v1616_v29 = vmul.f32 %v2328_v12, %v1610_v25 }
 0x415   :  { %v1688_v17 = vpack.c.bf16 %v1616_v29, %v1616_v29 }
 0x417   :  { %2007 = vmatmul.mubr.bf16.vlgmr.msra.gmra.mrb[24].mxu1 %v1688_v17 }
 0x4ea   :  { %v1731_v11 = vpop.f32.mrb[24].mxu1 }
 0x4eb   :  { %v1737_v35 = vmul.f32 %v1731_v11, %v1731_v11  ;;  %v2008_v8 = vpop.f32.mrb[25].mxu1  ;;  %v1747_v33 = vmul.f32 0.87758255, %v1731_v11  ;;  %v1852_v52 = vadd.f32 -0.23971277, %v1731_v11 }
 0x4ec   :  { %v1734_v0 = vpop.f32.mrb[26].mxu1  ;;  %vm1750_vm6 = vcmp.gt.f32.partialorder %v1731_v11, -0.87758255 }
 0x4ed   :  { %v1738_v56 = vsub.f32 1.0, %v1737_v35  ;;  %v2009_v47 = vpop.f32.mrb[27].mxu1 }
 0x4ef   :  { %v1739_v41 = vmax.f32 %v1738_v56, 0.0 }
 0x4f1   :  { %2329 = vrsqrt.f32 %v1739_v41  ;;  %vm1742_vm3 = vcmp.eq.f32.partialorder %v1739_v41, inf  ;;  %v1745_v51 = vand.u32 2147483648, %v1739_v41  ;;  %vm1744_vm4 = vcmp.eq.f32.partialorder %v1739_v41, 0.0 }
 0x4fb   :  { %v2330_v14 = vpop.eup %2329 }
 0x4fc   :  { %v1741_v62 = vmul.f32 %v2330_v14, %v1739_v41 }
 0x4fe   :  { %v1743_v19 = vsel %vm1742_vm3, %v1739_v41, %v1741_v62 }
 0x4ff   :  { %v1746_v2 = vsel %vm1744_vm4, %v1745_v51, %v1743_v19 }
 0x500   :  { %v1748_v39 = vmul.f32 0.47942555, %v1746_v2 }
 0x502   :  { %v1749_v43 = vsub.f32 %v1747_v33, %v1748_v39 }
 0x504   :  { %v1752_v59 = vsel %vm1750_vm6, %v1749_v43, %v1852_v52 }
 0x505   :  { %v1758_v6 = vsel %vm1757_vm5, %v1752_v59, %v1731_v11 }
 0x506   :  { %v1759_v49 = vmul.f32 30.0, %v1758_v6 }
 0x508   :  { %1760 = vst [vmem:[#allocation5] sm:$0xff] %v1759_v49 }
 0x509   :  { %2342 = shalt.err (!%p2339_p5)
}
 0x50a   :  { %s2343_s10 = scalar_lea.hbm %s3841_s8, 128 }
 0x50b   :  { %p2344_p6 = scmp.ne.s32.totalorder %s3841_s8, %s2343_s10  ;;  %p2347_p7 = scmp.lt.u32.totalorder %s2343_s10, %s3841_s8 }
 0x50d   :  { %p2349_p8 = pnand %p2347_p7, %p2344_p6 }
 0x50f   :  { %2352 = shalt.err (!%p2349_p8)
}
 0x510   :  { %1770 = dma.vmem_to_hbm [thread:$0]  %s1768_s28, 128, %s3841_s8, [#allocation6]  }
 0x511   :  { %2353 = dma.done.wait [#allocation6], 128  }
 0x512   :  { %2354 = vsyncadd [#allocation6], 4294967168 }
 0x513   :  { %1774 = vsyncpa [#allocation6], 1 }

</bundles_post_ra>
